<compile_context>
chip_gen: v7x
topology: tpu7x:2x2x1
jax: 0.10.0
libtpu: 0.0.40
codegen_flags: <defaults>
</compile_context>

<pallas_src>
import math
import functools

import jax
import jax.numpy as jnp
from jax.experimental import pallas as pl
from jax.experimental.pallas import tpu as pltpu


def _round_up(x, m):
    return ((x + m - 1) // m) * m


def _silu(y):
    return y / (1.0 + jnp.exp(-y))


# ----------------------------- Pallas kernels -----------------------------

def _matmul_bias_kernel(a_ref, w_ref, b_ref, o_ref):
    """(TM, K) x (K, TN) + (1, TN); bf16 MXU operands, f32 accumulation."""
    y = jnp.dot(a_ref[...].astype(jnp.bfloat16), w_ref[...],
                preferred_element_type=jnp.float32) + b_ref[...]
    o_ref[...] = y.astype(o_ref.dtype)


@jax.jit
def matmul_bias(a, wp, bp):
    """a: (M, K); wp: (K, Npad) bf16 pre-padded; bp: (1, Npad) f32 -> (M, Npad) bf16."""
    M, K = a.shape
    Npad = wp.shape[1]
    if M <= 512:
        M_pad = _round_up(M, 8)
        TM = M_pad
    else:
        M_pad = _round_up(M, 512)
        TM = 512
    TN = 256 if Npad % 256 == 0 else 128
    a_p = a if M_pad == M else jnp.pad(a, ((0, M_pad - M), (0, 0)))
    out = pl.pallas_call(
        _matmul_bias_kernel,
        out_shape=jax.ShapeDtypeStruct((M_pad, Npad), jnp.bfloat16),
        grid=(M_pad // TM, Npad // TN),
        in_specs=[
            pl.BlockSpec((TM, K), lambda i, j: (i, 0)),
            pl.BlockSpec((K, TN), lambda i, j: (0, j)),
            pl.BlockSpec((1, TN), lambda i, j: (0, j)),
        ],
        out_specs=pl.BlockSpec((TM, TN), lambda i, j: (i, j)),
        compiler_params=pltpu.CompilerParams(
            dimension_semantics=("parallel", "parallel")),
    )(a_p, wp, bp)
    return out if M_pad == M else out[:M]


def _conv3x3_kernel(x_ref, w_ref, b_ref, ml_ref, mr_ref, *rest,
                    H, W, P, apply_silu, has_residual):
    """Fused 3x3 conv (stride 1, pad 1) on a dense (H*W, Cin) image.

    Halo handling is in-kernel: a zeroed VMEM slab gets the image copied at a
    sublane-aligned offset P (built once per image, guarded by pl.when on the
    Cout-tile grid axis).  Each of the 9 taps is a shifted (M, Cin) x (Cin, TCo)
    bf16 matmul; column-shifted taps are masked at the left/right image edges
    with (M, 1) masks.  Bias, optional SiLU and optional residual add fused.
    """
    if has_residual:
        res_ref, o_ref, slab_ref = rest
    else:
        o_ref, slab_ref = rest
    M = H * W

    @pl.when(pl.program_id(1) == 0)
    def _():
        slab_ref[...] = jnp.zeros_like(slab_ref)
        slab_ref[pl.ds(P, M), :] = x_ref[0]

    def col_group(dj):
        acc = None
        for ky in range(3):                       # ky = di + 1
            t = ky * 3 + (dj + 1)                 # tap index (ky, kx)
            off = P + (ky - 1) * W + dj           # static offset into the slab
            patch = slab_ref[pl.ds(off, M), :]    # (M, Cin) bf16
            part = jnp.dot(patch, w_ref[t], preferred_element_type=jnp.float32)
            acc = part if acc is None else acc + part
        return acc

    y = col_group(0)
    y = y + col_group(-1) * ml_ref[...]           # mask out image-left column
    y = y + col_group(1) * mr_ref[...]            # mask out image-right column
    y = y + b_ref[...]
    if apply_silu:
        y = _silu(y)
    if has_residual:
        y = y + res_ref[0].astype(jnp.float32)
    o_ref[0] = y.astype(o_ref.dtype)


@functools.partial(jax.jit, static_argnames=("H", "W", "apply_silu", "has_residual"))
def _conv3x3_pallas(x, w, b, residual, *, H, W, apply_silu, has_residual):
    N, M, Cin_pad = x.shape
    Cout_pad = w.shape[2]
    TCo = 256 if Cout_pad % 256 == 0 else 128
    P = _round_up(W + 1, 8)                              # aligned interior copy
    slab_rows = _round_up(P + (H + 1) * W + 2, 8)

    cols = jnp.arange(M, dtype=jnp.int32) % W
    mask_l = (cols != 0).astype(jnp.float32).reshape(M, 1)
    mask_r = (cols != W - 1).astype(jnp.float32).reshape(M, 1)

    kernel = functools.partial(_conv3x3_kernel, H=H, W=W, P=P,
                               apply_silu=apply_silu, has_residual=has_residual)
    in_specs = [
        pl.BlockSpec((1, M, Cin_pad), lambda n, j: (n, 0, 0)),
        pl.BlockSpec((9, Cin_pad, TCo), lambda n, j: (0, 0, j)),
        pl.BlockSpec((1, TCo), lambda n, j: (0, j)),
        pl.BlockSpec((M, 1), lambda n, j: (0, 0)),
        pl.BlockSpec((M, 1), lambda n, j: (0, 0)),
    ]
    args = [x, w, b, mask_l, mask_r]
    if has_residual:
        in_specs.append(pl.BlockSpec((1, M, TCo), lambda n, j: (n, 0, j)))
        args.append(residual)

    return pl.pallas_call(
        kernel,
        out_shape=jax.ShapeDtypeStruct((N, M, Cout_pad), jnp.bfloat16),
        grid=(N, Cout_pad // TCo),
        in_specs=in_specs,
        out_specs=pl.BlockSpec((1, M, TCo), lambda n, j: (n, 0, j)),
        scratch_shapes=[pltpu.VMEM((slab_rows, Cin_pad), jnp.bfloat16)],
        compiler_params=pltpu.CompilerParams(
            dimension_semantics=("parallel", "arbitrary")),
    )(*args)


def conv3x3(x, H, W, cp, apply_silu=False, residual=None):
    """x: (N, H*W, Cin_pad) bf16 -> (N, H*W, Cout_pad) bf16."""
    return _conv3x3_pallas(x, cp['w'], cp['b'], residual, H=H, W=W,
                           apply_silu=apply_silu,
                           has_residual=residual is not None)


def _gn_kernel(x_ref, a_ref, scl_ref, sft_ref, o_ref, *, eps, apply_silu):
    """GroupNorm (two-pass variance) + folded affine/FiLM + optional SiLU.

    Group statistics via a (1, C) x (C, C) matmul against the group-averaging
    matrix so channels stay in the lane dimension; padded channels have zero
    gamma/beta so they stay exactly zero."""
    x = x_ref[0].astype(jnp.float32)                     # (HW, C)
    inv_n = 1.0 / x.shape[0]
    s1 = jnp.sum(x, axis=0, keepdims=True)
    mean = jnp.dot(s1, a_ref[...], preferred_element_type=jnp.float32) * inv_n
    d = x - mean
    s2 = jnp.sum(d * d, axis=0, keepdims=True)
    var = jnp.dot(s2, a_ref[...], preferred_element_type=jnp.float32) * inv_n
    y = d * jax.lax.rsqrt(var + eps) * scl_ref[0] + sft_ref[0]
    if apply_silu:
        y = _silu(y)
    o_ref[0] = y.astype(o_ref.dtype)


@functools.partial(jax.jit, static_argnames=("apply_silu",))
def _groupnorm_pallas(xf, A, scl, sft, *, apply_silu):
    N, HW, C = xf.shape
    kernel = functools.partial(_gn_kernel, eps=1e-5, apply_silu=apply_silu)
    return pl.pallas_call(
        kernel,
        out_shape=jax.ShapeDtypeStruct((N, HW, C), jnp.bfloat16),
        grid=(N,),
        in_specs=[
            pl.BlockSpec((1, HW, C), lambda n: (n, 0, 0)),
            pl.BlockSpec((C, C), lambda n: (0, 0)),
            pl.BlockSpec((1, 1, C), lambda n: (n, 0, 0)),
            pl.BlockSpec((1, 1, C), lambda n: (n, 0, 0)),
        ],
        out_specs=pl.BlockSpec((1, HW, C), lambda n: (n, 0, 0)),
        compiler_params=pltpu.CompilerParams(dimension_semantics=("parallel",)),
    )(xf, A, scl, sft)


def group_norm(x, gn, eff_scale=None, eff_shift=None, apply_silu=False):
    """x: (N, HW, Cpad) bf16.  eff_scale/shift: optional (N, 1, Cpad) FiLM-folded affine."""
    N, HW, C = x.shape
    if eff_scale is None:
        eff_scale = jnp.broadcast_to(gn['gamma'][None, None, :], (N, 1, C))
        eff_shift = jnp.broadcast_to(gn['beta'][None, None, :], (N, 1, C))
    return _groupnorm_pallas(x, gn['A'], eff_scale, eff_shift, apply_silu=apply_silu)


def _attn_kernel(hn_ref, x_ref, wqkv_ref, bqkv_ref, wproj_ref, bproj_ref, o_ref,
                 *, heads, hc, scale):
    """Fused per-image multi-head attention block:
       qkv projection -> per-head softmax(QK^T/sqrt(c))V -> output projection
       (accumulated per head, no lane concat) -> +residual.  Exact softmax."""
    hn = hn_ref[0]                                       # (HW, Cpad) bf16
    qkv = jnp.dot(hn, wqkv_ref[...],
                  preferred_element_type=jnp.float32) + bqkv_ref[...]
    acc = None
    for h in range(heads):
        base = 3 * hc * h
        q = qkv[:, base:base + hc].astype(jnp.bfloat16)
        k = qkv[:, base + hc:base + 2 * hc].astype(jnp.bfloat16)
        v = qkv[:, base + 2 * hc:base + 3 * hc].astype(jnp.bfloat16)
        s = jnp.einsum('qc,kc->qk', q, k,
                       preferred_element_type=jnp.float32) * scale
        s = s - jnp.max(s, axis=-1, keepdims=True)
        p = jnp.exp(s)
        p = p / jnp.sum(p, axis=-1, keepdims=True)
        o_h = jnp.dot(p.astype(jnp.bfloat16), v, preferred_element_type=jnp.float32)
        part = jnp.dot(o_h.astype(jnp.bfloat16), wproj_ref[h * hc:(h + 1) * hc, :],
                       preferred_element_type=jnp.float32)
        acc = part if acc is None else acc + part
    y = acc + bproj_ref[...] + x_ref[0].astype(jnp.float32)
    o_ref[0] = y.astype(o_ref.dtype)
    # TODO(synk): for large HW switch to online-softmax tiling over the key axis
    # instead of materializing the full (HW, HW) score matrix.


@functools.partial(jax.jit, static_argnames=("heads", "hc"))
def _attention_pallas(hn, x, wqkv, bqkv, wproj, bproj, *, heads, hc):
    N, HW, Cpad = hn.shape
    Kqkv = wqkv.shape[1]
    kernel = functools.partial(_attn_kernel, heads=heads, hc=hc,
                               scale=1.0 / math.sqrt(hc))
    return pl.pallas_call(
        kernel,
        out_shape=jax.ShapeDtypeStruct((N, HW, Cpad), jnp.bfloat16),
        grid=(N,),
        in_specs=[
            pl.BlockSpec((1, HW, Cpad), lambda n: (n, 0, 0)),
            pl.BlockSpec((1, HW, Cpad), lambda n: (n, 0, 0)),
            pl.BlockSpec((Cpad, Kqkv), lambda n: (0, 0)),
            pl.BlockSpec((1, Kqkv), lambda n: (0, 0)),
            pl.BlockSpec((heads * hc, Cpad), lambda n: (0, 0)),
            pl.BlockSpec((1, Cpad), lambda n: (0, 0)),
        ],
        out_specs=pl.BlockSpec((1, HW, Cpad), lambda n: (n, 0, 0)),
        compiler_params=pltpu.CompilerParams(dimension_semantics=("parallel",)),
    )(hn, x, wqkv, bqkv, wproj, bproj)


# ------------------------------ JAX glue ops -------------------------------

def avg_pool2(x, H, W):
    # TODO(synk): could be fused into the preceding GroupNorm kernel's output.
    N, HW, C = x.shape
    x4 = x.reshape(N, H // 2, 2, W // 2, 2, C).astype(jnp.float32)
    return x4.mean(axis=(2, 4)).reshape(N, (H // 2) * (W // 2), C).astype(jnp.bfloat16)


def timestep_embedding(t, ch):
    half = ch // 2
    coef = jnp.exp(jnp.arange(half, dtype=jnp.float32)
                   * (-(math.log(10000.0) / (half - 1))))
    emb = t[:, None].astype(jnp.float32) * coef[None, :]
    return jnp.concatenate([jnp.sin(emb), jnp.cos(emb)], axis=1)


# ----------------------------- Parameter init ------------------------------

def _group_matrix(c, num_groups, c_pad):
    cg = c // num_groups
    idx = jnp.arange(c_pad)
    g = idx // cg
    real = idx < c
    same = (g[:, None] == g[None, :]) & real[:, None] & real[None, :]
    return same.astype(jnp.float32) / float(cg)


def init_gn(c, num_groups):
    cpad = _round_up(c, 128)
    gamma = jnp.zeros((cpad,), jnp.float32).at[:c].set(1.0)
    beta = jnp.zeros((cpad,), jnp.float32)
    return {'gamma': gamma, 'beta': beta, 'A': _group_matrix(c, num_groups, cpad)}


def init_linear_xla(key, out_f, in_f):
    kw_, kb_ = jax.random.split(key)
    w = jax.random.normal(kw_, (in_f, out_f), jnp.float32) / math.sqrt(in_f)
    b = 0.01 * jax.random.normal(kb_, (out_f,), jnp.float32)
    return {'w': w, 'b': b}


def init_dense_pallas(key, out_f, in_f, *, in_pad, out_pad):
    kw_, kb_ = jax.random.split(key)
    w = jax.random.normal(kw_, (in_f, out_f), jnp.float32) / math.sqrt(in_f)
    b = 0.01 * jax.random.normal(kb_, (out_f,), jnp.float32)
    wp = jnp.zeros((in_pad, out_pad), jnp.float32).at[:in_f, :out_f].set(w)
    bp = jnp.zeros((1, out_pad), jnp.float32).at[0, :out_f].set(b)
    return {'w': wp.astype(jnp.bfloat16), 'b': bp, 'nout': out_f}


def init_conv3x3(key, cout, cin):
    kw_, kb_ = jax.random.split(key)
    cin_pad = _round_up(cin, 128)
    cout_pad = _round_up(cout, 128)
    w = jax.random.normal(kw_, (cout, cin, 3, 3), jnp.float32) / math.sqrt(cin * 9)
    b = 0.01 * jax.random.normal(kb_, (cout,), jnp.float32)
    wt = jnp.transpose(w, (2, 3, 1, 0)).reshape(9, cin, cout)
    wp = jnp.zeros((9, cin_pad, cout_pad), jnp.float32).at[:, :cin, :cout].set(wt)
    bp = jnp.zeros((1, cout_pad), jnp.float32).at[0, :cout].set(b)
    return {'w': wp.astype(jnp.bfloat16), 'b': bp, 'cout': cout}


def init_resblock(key, ch_in, ch_out, ch_emb, num_groups, is_down=False):
    keys = jax.random.split(key, 4)
    return {
        'in_norm': init_gn(ch_in, num_groups),
        'in_conv': init_conv3x3(keys[0], ch_out, ch_in),
        'emb': init_linear_xla(keys[1], 2 * ch_out, ch_emb),
        'norm': init_gn(ch_out, num_groups),
        'out_conv': init_conv3x3(keys[2], ch_out, ch_out),
        'skip': None if ch_in == ch_out else init_dense_pallas(
            keys[3], ch_out, ch_in,
            in_pad=_round_up(ch_in, 128), out_pad=_round_up(ch_out, 128)),
        'is_down': is_down,
        'ch_out': ch_out,
    }


def init_mha(key, ch_in, num_heads, head_ch, num_groups):
    k1, k2 = jax.random.split(key)
    cpad = _round_up(ch_in, 128)
    return {
        'norm': init_gn(ch_in, num_groups),
        # all heads' q/k/v 1x1 convs fused into one projection, consumed in-kernel
        'qkv': init_dense_pallas(k1, num_heads * 3 * head_ch, ch_in,
                                 in_pad=cpad, out_pad=num_heads * 3 * head_ch),
        'proj': init_dense_pallas(k2, ch_in, num_heads * head_ch,
                                  in_pad=num_heads * head_ch, out_pad=cpad),
        'num_heads': num_heads,
        'head_ch': head_ch,
    }


def init_unet_encoder(key, *, image_size, in_channel, out_channel,
                      num_head_channel, model_channel, channel_mult,
                      attention_resolutions, num_res_block, num_heads,
                      num_groups):
    keys = iter(jax.random.split(key, 256))
    emb_ch = model_channel * 4
    params = {
        'model_channel': model_channel,
        'temb1': init_linear_xla(next(keys), emb_ch, model_channel),
        'temb2': init_linear_xla(next(keys), emb_ch, emb_ch),
    }
    input_blocks = [[('conv', init_conv3x3(next(keys), model_channel, in_channel))]]
    ch = model_channel
    for idx, mult in enumerate(channel_mult):
        for _ in range(num_res_block):
            layers = [('res', init_resblock(next(keys), ch, model_channel * mult,
                                            emb_ch, num_groups))]
            ch = model_channel * mult
            if image_size // (2 ** idx) in attention_resolutions:
                layers.append(('attn', init_mha(next(keys), ch, num_heads,
                                                num_head_channel, num_groups)))
            input_blocks.append(layers)
        if idx < len(channel_mult) - 1:
            input_blocks.append([('res', init_resblock(next(keys), ch, ch, emb_ch,
                                                       num_groups, is_down=True))])
    params['input_blocks'] = input_blocks
    params['middle'] = [
        ('res', init_resblock(next(keys), ch, ch, emb_ch, num_groups)),
        ('attn', init_mha(next(keys), ch, num_heads, num_head_channel, num_groups)),
        ('res', init_resblock(next(keys), ch, ch, emb_ch, num_groups)),
    ]
    params['out_norm'] = init_gn(ch, num_groups)
    params['out_ch'] = ch
    params['out_conv'] = init_linear_xla(next(keys), out_channel, ch)
    return params


# ------------------------------ Forward pass -------------------------------

def resblock_forward(p, x, H, W, temb_silu):
    N, _, cpad_in = x.shape
    h = group_norm(x, p['in_norm'], apply_silu=True)           # GN + SiLU fused
    if p['is_down']:
        h = avg_pool2(h, H, W)
        x = avg_pool2(x, H, W)
        H, W = H // 2, W // 2
    cout = p['ch_out']
    cpad_out = p['in_conv']['w'].shape[2]
    h = conv3x3(h, H, W, p['in_conv'])
    # FiLM (tiny M = batch linear -> plain XLA), folded into the GN affine.
    emb = temb_silu @ p['emb']['w'] + p['emb']['b']            # (N, 2*cout)
    scale = jnp.pad(emb[:, :cout], ((0, 0), (0, cpad_out - cout)))
    shift = jnp.pad(emb[:, cout:2 * cout], ((0, 0), (0, cpad_out - cout)))
    gamma, beta = p['norm']['gamma'], p['norm']['beta']
    eff_scale = (gamma[None, :] * (1.0 + scale))[:, None, :]
    eff_shift = (beta[None, :] * (1.0 + scale) + shift)[:, None, :]
    h = group_norm(h, p['norm'], eff_scale, eff_shift, apply_silu=True)
    # TODO(synk): nn.Dropout(p=0.3) is treated as eval-mode identity (no RNG mask).
    if p['skip'] is None:
        x_skip = x
    else:
        x_skip = matmul_bias(x.reshape(N * H * W, cpad_in),
                             p['skip']['w'], p['skip']['b'])
        x_skip = x_skip.reshape(N, H * W, cpad_out)
    h = conv3x3(h, H, W, p['out_conv'], residual=x_skip)       # residual add fused
    return h, H, W


def mha_forward(p, x):
    hn = group_norm(x, p['norm'])
    return _attention_pallas(hn, x, p['qkv']['w'], p['qkv']['b'],
                             p['proj']['w'], p['proj']['b'],
                             heads=p['num_heads'], hc=p['head_ch'])


def unet_encoder_forward(params, x_nchw, t):
    N, Cin, H, W = x_nchw.shape
    mc = params['model_channel']

    # Timestep MLP (M = batch): plain XLA.
    temb = timestep_embedding(t, mc)
    temb = _silu(temb @ params['temb1']['w'] + params['temb1']['b'])
    temb = temb @ params['temb2']['w'] + params['temb2']['b']
    temb_silu = _silu(temb)            # hoisted SiLU shared by all ResBlocks

    # NCHW -> (N, H*W, Cpad) bf16 once; padded channel lanes stay zero end-to-end.
    cin_pad = _round_up(Cin, 128)
    x = jnp.transpose(x_nchw, (0, 2, 3, 1)).reshape(N, H * W, Cin)
    x = jnp.pad(x, ((0, 0), (0, 0), (0, cin_pad - Cin))).astype(jnp.bfloat16)

    def apply_block(layers, h, H, W):
        for kind, p in layers:
            if kind == 'conv':
                h = conv3x3(h, H, W, p)
            elif kind == 'res':
                h, H, W = resblock_forward(p, h, H, W, temb_silu)
            else:
                h = mha_forward(p, h)
        return h, H, W

    for layers in params['input_blocks']:
        x, H, W = apply_block(layers, x, H, W)
    x, H, W = apply_block(params['middle'], x, H, W)

    h = group_norm(x, params['out_norm'], apply_silu=True)     # GN + SiLU fused
    h = h.astype(jnp.float32).mean(axis=1)                     # AdaptiveAvgPool2d((1,1))
    h = h[:, :params['out_ch']]
    out = h @ params['out_conv']['w'] + params['out_conv']['b']
    return out                                                 # Flatten -> (N, out_channel)


# ---------------------------------- Main -----------------------------------

if __name__ == "__main__":
    key = jax.random.PRNGKey(0)
    k_param, k_x, k_t = jax.random.split(key, 3)

    # Small config consistent with the module's constructor arguments.
    cfg = dict(image_size=16, in_channel=3, out_channel=3,
               num_head_channel=8, model_channel=32, channel_mult=[1, 2],
               attention_resolutions=[8], num_res_block=1, num_heads=2,
               num_groups=8)

    params = init_unet_encoder(k_param, **cfg)
    x = jax.random.normal(k_x, (2, 3, 16, 16), jnp.float32)    # NCHW input
    t = jnp.array([1.0, 11.0], dtype=jnp.float32)              # timesteps

    out = unet_encoder_forward(params, x, t)
    out = jax.block_until_ready(out)
    assert out.shape == (2, 3) and bool(jnp.all(jnp.isfinite(out)))
    print("KERNEL_OK")
</pallas_src>

<mosaic_0001>
module attributes {stable_mosaic.version = 11 : i64} {
  func.func @_conv3x3_kernel(%arg0: i32, %arg1: i32, %arg2: memref<1x256x128xbf16, #tpu.memory_space<vmem>>, %arg3: memref<9x128x128xbf16, #tpu.memory_space<vmem>>, %arg4: memref<1x128xf32, #tpu.memory_space<vmem>>, %arg5: memref<256x1xf32, #tpu.memory_space<vmem>>, %arg6: memref<256x1xf32, #tpu.memory_space<vmem>>, %arg7: memref<1x256x128xbf16, #tpu.memory_space<vmem>>, %arg8: memref<304x128xbf16, #tpu.memory_space<vmem>>) attributes {dimension_semantics = [#tpu.dimension_semantics<parallel>, #tpu.dimension_semantics<arbitrary>], iteration_bounds = array<i64: 2, 1>, scalar_prefetch = 0 : i64, scratch_operands = 1 : i64, tpu.core_type = #tpu.core_type<tc>, window_params = [{transform_indices = @transform_0, window_bounds = array<i64: 1, 256, 128>}, {transform_indices = @transform_1, window_bounds = array<i64: 9, 128, 128>}, {transform_indices = @transform_2, window_bounds = array<i64: 1, 128>}, {pipeline_mode = #tpu.pipeline_mode<synchronous>, transform_indices = @transform_3, window_bounds = array<i64: 256, 1>}, {pipeline_mode = #tpu.pipeline_mode<synchronous>, transform_indices = @transform_4, window_bounds = array<i64: 256, 1>}, {transform_indices = @transform_5, window_bounds = array<i64: 1, 256, 128>}]} {
    %c0_i32 = arith.constant 0 : i32
    %0 = arith.cmpi eq, %arg1, %c0_i32 : i32
    %1 = arith.extui %0 : i1 to i32
    %c0_i32_0 = arith.constant 0 : i32
    %2 = arith.cmpi ne, %1, %c0_i32_0 : i32
    scf.if %2 {
      %cst_47 = arith.constant 0.000000e+00 : bf16
      %60 = vector.broadcast %cst_47 : bf16 to vector<304x128xbf16>
      %c0_48 = arith.constant 0 : index
      %c0_49 = arith.constant 0 : index
      %61 = vector.load %arg8[%c0_48, %c0_49] : memref<304x128xbf16, #tpu.memory_space<vmem>>, vector<304x128xbf16>
      tpu.vector_store %arg8[%c0_48, %c0_49], %60 {strides = array<i32>} : memref<304x128xbf16, #tpu.memory_space<vmem>>, vector<304x128xbf16>,
      %c0_50 = arith.constant 0 : index
      %c0_51 = arith.constant 0 : index
      %c0_52 = arith.constant 0 : index
      %62 = vector.load %arg2[%c0_50, %c0_51, %c0_52] : memref<1x256x128xbf16, #tpu.memory_space<vmem>>, vector<1x256x128xbf16>
      %63 = vector.shape_cast %62 : vector<1x256x128xbf16> to vector<256x128xbf16>
      %c24_53 = arith.constant 24 : index
      %c0_54 = arith.constant 0 : index
      %64 = vector.load %arg8[%c24_53, %c0_54] : memref<304x128xbf16, #tpu.memory_space<vmem>>, vector<256x128xbf16>
      tpu.vector_store %arg8[%c24_53, %c0_54], %63 {strides = array<i32>} : memref<304x128xbf16, #tpu.memory_space<vmem>>, vector<256x128xbf16>,
    } else {
    }
    %c8 = arith.constant 8 : index
    %c0 = arith.constant 0 : index
    %3 = vector.load %arg8[%c8, %c0] : memref<304x128xbf16, #tpu.memory_space<vmem>>, vector<256x128xbf16>
    %c1 = arith.constant 1 : index
    %c0_1 = arith.constant 0 : index
    %c0_2 = arith.constant 0 : index
    %4 = vector.load %arg3[%c1, %c0_1, %c0_2] : memref<9x128x128xbf16, #tpu.memory_space<vmem>>, vector<1x128x128xbf16>
    %5 = vector.shape_cast %4 : vector<1x128x128xbf16> to vector<128x128xbf16>
    %cst = arith.constant dense<0.000000e+00> : vector<256x128xf32>
    %6 = tpu.matmul %3, %5, %cst {dimension_numbers = #tpu.dot_dimension_numbers<[1], [0], [0], [1], [0, 0, 1, 1], [], []>} : vector<256x128xbf16>, vector<128x128xbf16>, vector<256x128xf32> -> vector<256x128xf32>
    %c24 = arith.constant 24 : index
    %c0_3 = arith.constant 0 : index
    %7 = vector.load %arg8[%c24, %c0_3] : memref<304x128xbf16, #tpu.memory_space<vmem>>, vector<256x128xbf16>
    %c4 = arith.constant 4 : index
    %c0_4 = arith.constant 0 : index
    %c0_5 = arith.constant 0 : index
    %8 = vector.load %arg3[%c4, %c0_4, %c0_5] : memref<9x128x128xbf16, #tpu.memory_space<vmem>>, vector<1x128x128xbf16>
    %9 = vector.shape_cast %8 : vector<1x128x128xbf16> to vector<128x128xbf16>
    %cst_6 = arith.constant dense<0.000000e+00> : vector<256x128xf32>
    %10 = tpu.matmul %7, %9, %cst_6 {dimension_numbers = #tpu.dot_dimension_numbers<[1], [0], [0], [1], [0, 0, 1, 1], [], []>} : vector<256x128xbf16>, vector<128x128xbf16>, vector<256x128xf32> -> vector<256x128xf32>
    %11 = arith.addf %6, %10 : vector<256x128xf32>
    %c40 = arith.constant 40 : index
    %c0_7 = arith.constant 0 : index
    %12 = vector.load %arg8[%c40, %c0_7] : memref<304x128xbf16, #tpu.memory_space<vmem>>, vector<256x128xbf16>
    %c7 = arith.constant 7 : index
    %c0_8 = arith.constant 0 : index
    %c0_9 = arith.constant 0 : index
    %13 = vector.load %arg3[%c7, %c0_8, %c0_9] : memref<9x128x128xbf16, #tpu.memory_space<vmem>>, vector<1x128x128xbf16>
    %14 = vector.shape_cast %13 : vector<1x128x128xbf16> to vector<128x128xbf16>
    %cst_10 = arith.constant dense<0.000000e+00> : vector<256x128xf32>
    %15 = tpu.matmul %12, %14, %cst_10 {dimension_numbers = #tpu.dot_dimension_numbers<[1], [0], [0], [1], [0, 0, 1, 1], [], []>} : vector<256x128xbf16>, vector<128x128xbf16>, vector<256x128xf32> -> vector<256x128xf32>
    %16 = arith.addf %11, %15 : vector<256x128xf32>
    %c7_11 = arith.constant 7 : index
    %c0_12 = arith.constant 0 : index
    %17 = vector.load %arg8[%c7_11, %c0_12] : memref<304x128xbf16, #tpu.memory_space<vmem>>, vector<256x128xbf16>
    %c0_13 = arith.constant 0 : index
    %c0_14 = arith.constant 0 : index
    %c0_15 = arith.constant 0 : index
    %18 = vector.load %arg3[%c0_13, %c0_14, %c0_15] : memref<9x128x128xbf16, #tpu.memory_space<vmem>>, vector<1x128x128xbf16>
    %19 = vector.shape_cast %18 : vector<1x128x128xbf16> to vector<128x128xbf16>
    %cst_16 = arith.constant dense<0.000000e+00> : vector<256x128xf32>
    %20 = tpu.matmul %17, %19, %cst_16 {dimension_numbers = #tpu.dot_dimension_numbers<[1], [0], [0], [1], [0, 0, 1, 1], [], []>} : vector<256x128xbf16>, vector<128x128xbf16>, vector<256x128xf32> -> vector<256x128xf32>
    %c23 = arith.constant 23 : index
    %c0_17 = arith.constant 0 : index
    %21 = vector.load %arg8[%c23, %c0_17] : memref<304x128xbf16, #tpu.memory_space<vmem>>, vector<256x128xbf16>
    %c3 = arith.constant 3 : index
    %c0_18 = arith.constant 0 : index
    %c0_19 = arith.constant 0 : index
    %22 = vector.load %arg3[%c3, %c0_18, %c0_19] : memref<9x128x128xbf16, #tpu.memory_space<vmem>>, vector<1x128x128xbf16>
    %23 = vector.shape_cast %22 : vector<1x128x128xbf16> to vector<128x128xbf16>
    %cst_20 = arith.constant dense<0.000000e+00> : vector<256x128xf32>
    %24 = tpu.matmul %21, %23, %cst_20 {dimension_numbers = #tpu.dot_dimension_numbers<[1], [0], [0], [1], [0, 0, 1, 1], [], []>} : vector<256x128xbf16>, vector<128x128xbf16>, vector<256x128xf32> -> vector<256x128xf32>
    %25 = arith.addf %20, %24 : vector<256x128xf32>
    %c39 = arith.constant 39 : index
    %c0_21 = arith.constant 0 : index
    %26 = vector.load %arg8[%c39, %c0_21] : memref<304x128xbf16, #tpu.memory_space<vmem>>, vector<256x128xbf16>
    %c6 = arith.constant 6 : index
    %c0_22 = arith.constant 0 : index
    %c0_23 = arith.constant 0 : index
    %27 = vector.load %arg3[%c6, %c0_22, %c0_23] : memref<9x128x128xbf16, #tpu.memory_space<vmem>>, vector<1x128x128xbf16>
    %28 = vector.shape_cast %27 : vector<1x128x128xbf16> to vector<128x128xbf16>
    %cst_24 = arith.constant dense<0.000000e+00> : vector<256x128xf32>
    %29 = tpu.matmul %26, %28, %cst_24 {dimension_numbers = #tpu.dot_dimension_numbers<[1], [0], [0], [1], [0, 0, 1, 1], [], []>} : vector<256x128xbf16>, vector<128x128xbf16>, vector<256x128xf32> -> vector<256x128xf32>
    %30 = arith.addf %25, %29 : vector<256x128xf32>
    %c0_25 = arith.constant 0 : index
    %c0_26 = arith.constant 0 : index
    %31 = vector.load %arg5[%c0_25, %c0_26] : memref<256x1xf32, #tpu.memory_space<vmem>>, vector<256x1xf32>
    %32 = vector.broadcast %31 : vector<256x1xf32> to vector<256x128xf32>
    %33 = arith.mulf %30, %32 : vector<256x128xf32>
    %34 = arith.addf %16, %33 : vector<256x128xf32>
    %c9 = arith.constant 9 : index
    %c0_27 = arith.constant 0 : index
    %35 = vector.load %arg8[%c9, %c0_27] : memref<304x128xbf16, #tpu.memory_space<vmem>>, vector<256x128xbf16>
    %c2 = arith.constant 2 : index
    %c0_28 = arith.constant 0 : index
    %c0_29 = arith.constant 0 : index
    %36 = vector.load %arg3[%c2, %c0_28, %c0_29] : memref<9x128x128xbf16, #tpu.memory_space<vmem>>, vector<1x128x128xbf16>
    %37 = vector.shape_cast %36 : vector<1x128x128xbf16> to vector<128x128xbf16>
    %cst_30 = arith.constant dense<0.000000e+00> : vector<256x128xf32>
    %38 = tpu.matmul %35, %37, %cst_30 {dimension_numbers = #tpu.dot_dimension_numbers<[1], [0], [0], [1], [0, 0, 1, 1], [], []>} : vector<256x128xbf16>, vector<128x128xbf16>, vector<256x128xf32> -> vector<256x128xf32>
    %c25 = arith.constant 25 : index
    %c0_31 = arith.constant 0 : index
    %39 = vector.load %arg8[%c25, %c0_31] : memref<304x128xbf16, #tpu.memory_space<vmem>>, vector<256x128xbf16>
    %c5 = arith.constant 5 : index
    %c0_32 = arith.constant 0 : index
    %c0_33 = arith.constant 0 : index
    %40 = vector.load %arg3[%c5, %c0_32, %c0_33] : memref<9x128x128xbf16, #tpu.memory_space<vmem>>, vector<1x128x128xbf16>
    %41 = vector.shape_cast %40 : vector<1x128x128xbf16> to vector<128x128xbf16>
    %cst_34 = arith.constant dense<0.000000e+00> : vector<256x128xf32>
    %42 = tpu.matmul %39, %41, %cst_34 {dimension_numbers = #tpu.dot_dimension_numbers<[1], [0], [0], [1], [0, 0, 1, 1], [], []>} : vector<256x128xbf16>, vector<128x128xbf16>, vector<256x128xf32> -> vector<256x128xf32>
    %43 = arith.addf %38, %42 : vector<256x128xf32>
    %c41 = arith.constant 41 : index
    %c0_35 = arith.constant 0 : index
    %44 = vector.load %arg8[%c41, %c0_35] : memref<304x128xbf16, #tpu.memory_space<vmem>>, vector<256x128xbf16>
    %c8_36 = arith.constant 8 : index
    %c0_37 = arith.constant 0 : index
    %c0_38 = arith.constant 0 : index
    %45 = vector.load %arg3[%c8_36, %c0_37, %c0_38] : memref<9x128x128xbf16, #tpu.memory_space<vmem>>, vector<1x128x128xbf16>
    %46 = vector.shape_cast %45 : vector<1x128x128xbf16> to vector<128x128xbf16>
    %cst_39 = arith.constant dense<0.000000e+00> : vector<256x128xf32>
    %47 = tpu.matmul %44, %46, %cst_39 {dimension_numbers = #tpu.dot_dimension_numbers<[1], [0], [0], [1], [0, 0, 1, 1], [], []>} : vector<256x128xbf16>, vector<128x128xbf16>, vector<256x128xf32> -> vector<256x128xf32>
    %48 = arith.addf %43, %47 : vector<256x128xf32>
    %c0_40 = arith.constant 0 : index
    %c0_41 = arith.constant 0 : index
    %49 = vector.load %arg6[%c0_40, %c0_41] : memref<256x1xf32, #tpu.memory_space<vmem>>, vector<256x1xf32>
    %50 = vector.broadcast %49 : vector<256x1xf32> to vector<256x128xf32>
    %51 = arith.mulf %48, %50 : vector<256x128xf32>
    %52 = arith.addf %34, %51 : vector<256x128xf32>
    %c0_42 = arith.constant 0 : index
    %c0_43 = arith.constant 0 : index
    %53 = vector.load %arg4[%c0_42, %c0_43] : memref<1x128xf32, #tpu.memory_space<vmem>>, vector<1x128xf32>
    %54 = vector.broadcast %53 : vector<1x128xf32> to vector<256x128xf32>
    %55 = arith.addf %52, %54 : vector<256x128xf32>
    %56 = arith.truncf %55 : vector<256x128xf32> to vector<256x128xbf16>
    %c0_44 = arith.constant 0 : index
    %c0_45 = arith.constant 0 : index
    %c0_46 = arith.constant 0 : index
    %57 = vector.load %arg7[%c0_44, %c0_45, %c0_46] : memref<1x256x128xbf16, #tpu.memory_space<vmem>>, vector<1x256x128xbf16>
    %58 = vector.shape_cast %57 : vector<1x256x128xbf16> to vector<256x128xbf16>
    %59 = vector.shape_cast %56 : vector<256x128xbf16> to vector<1x256x128xbf16>
    tpu.vector_store %arg7[%c0_44, %c0_45, %c0_46], %59 {strides = array<i32>} : memref<1x256x128xbf16, #tpu.memory_space<vmem>>, vector<1x256x128xbf16>,
    return
  }
  func.func @transform_0(%arg0: i32, %arg1: i32) -> (i32, i32, i32) {
    %c0_i32 = arith.constant 0 : i32
    %c0_i32_0 = arith.constant 0 : i32
    %c0_i32_1 = arith.constant 0 : i32
    return %arg0, %c0_i32, %c0_i32_0 : i32, i32, i32
  }
  func.func @transform_1(%arg0: i32, %arg1: i32) -> (i32, i32, i32) {
    %c0_i32 = arith.constant 0 : i32
    %c0_i32_0 = arith.constant 0 : i32
    %c0_i32_1 = arith.constant 0 : i32
    return %c0_i32, %c0_i32_0, %arg1 : i32, i32, i32
  }
  func.func @transform_2(%arg0: i32, %arg1: i32) -> (i32, i32) {
    %c0_i32 = arith.constant 0 : i32
    %c0_i32_0 = arith.constant 0 : i32
    return %c0_i32, %arg1 : i32, i32
  }
  func.func @transform_3(%arg0: i32, %arg1: i32) -> (i32, i32) {
    %c0_i32 = arith.constant 0 : i32
    %c0_i32_0 = arith.constant 0 : i32
    %c0_i32_1 = arith.constant 0 : i32
    return %c0_i32, %c0_i32_0 : i32, i32
  }
  func.func @transform_4(%arg0: i32, %arg1: i32) -> (i32, i32) {
    %c0_i32 = arith.constant 0 : i32
    %c0_i32_0 = arith.constant 0 : i32
    %c0_i32_1 = arith.constant 0 : i32
    return %c0_i32, %c0_i32_0 : i32, i32
  }
  func.func @transform_5(%arg0: i32, %arg1: i32) -> (i32, i32, i32) {
    %c0_i32 = arith.constant 0 : i32
    %c0_i32_0 = arith.constant 0 : i32
    return %arg0, %c0_i32, %arg1 : i32, i32, i32
  }
}

</mosaic_0001>

<bundles_post_ra>
// kernel: _conv3x3_pallas.1
= control target key start
LH: loop header
LB: loop body
LE: loop exit
PB: predicated region body
PF: predicated region fallthrough
CT: control target
= control target key end

     0   :  { %10 = vsyncpa [#allocation4], 0  ;;  %s6864_s0 = inlined_call_operand.vmem [shape: bf16[2,256,128], index: 0, kind: input, shape index: {}]   ;;  %s6865_s1 = inlined_call_operand.hbm [shape: bf16[9,128,128], index: 1, kind: input, shape index: {}]   ;;  %s6866_s2 = inlined_call_operand.vmem [shape: f32[1,128], index: 2, kind: input, shape index: {}]   ;;  %s6867_s3 = inlined_call_operand.vmem [shape: f32[256,1], index: 3, kind: input, shape index: {}]   ;;  %s6868_s4 = inlined_call_operand.vmem [shape: f32[256,1], index: 4, kind: input, shape index: {}]   ;;  %s6869_s5 = inlined_call_operand.hbm [shape: bf16[2,256,128], index: 5, kind: output, shape index: {}]  }
   0x1   :  { %11 = vsyncpa [#allocation5], 0 }
   0x2   :  { %13 = vsyncpa [#allocation5 + $0x1], 0  ;;  %s5616_s18 = smov 0   ;;  %s5618_s19 = smov 0  }
   0x3   :  { %s5620_s20 = smov 0   ;;  %s5622_s21 = smov 0  }
   0x4   :  { %s5624_s22 = smov 0   ;;  %s5626_s23 = smov 0  }
   0x5 LB: > { %s4164_s24 = sadd.s32 4294967295, %s5577_s23   ;;  %s4165_s25 = sadd.s32 4294967294, %s5577_s23   ;;  %s5577_s23 = sphi %s5626_s23, %s19_s23   ;;  %s5573_s22 = sphi %s5624_s22, %s6951_s22   ;;  %s5569_s21 = sphi %s5622_s21, %s6950_s21   ;;  %s5565_s20 = sphi %s5620_s20, %s6949_s20   ;;  %s5561_s19 = sphi %s5618_s19, %s6948_s19   ;;  %s5557_s18 = sphi %s5616_s18, %s6947_s18  }
   0x6   : > { %s31_s26 = sadd.s32 1, %s5573_s22  ;;  %s160_s27 = sadd.s32 1, %s5565_s20 }
   0x7   : > { %p33_p0 = scmp.ge.s32.totalorder %s31_s26, 2  ;;  %p170_p1 = scmp.ne.s32.totalorder %s5565_s20, %s5561_s19 }
   0x8   : > { %p171_p2 = scmp.eq.s32.totalorder %s4164_s24, 1  ;;  %p176_p3 = scmp.ne.s32.totalorder %s5561_s19, %s5557_s18 }
   0x9   : > { %s6953_s26 = smov (%p33_p0, %s31_s26), 0  ;;  %p177_p5 = scmp.eq.s32.totalorder %s4165_s25, 1 }
   0xa   : > { %p5656_p4 = por %p171_p2, %p170_p1  ;;  %s155_s29 = ssub.s32 %s5573_s22, %s6953_s26 }
   0xb   : > { %p4166_p6 = scmp.ge.s32.totalorder %s5577_s23, 1  ;;  %p158_p7 = scmp.eq.s32.totalorder %s155_s29, 0 }
   0xc   : > { %s6874_s28 = scalar_select %p5656_p4, 1, 0 }
   0xd   : > { %p5663_p8 = por %p177_p5, %p176_p3  ;;  %p184_p9 = scmp.lt.s32.totalorder %s5577_s23, 3 }
   0xe   : > { %s5669_s6 = scalar_select %p158_p7, %s5565_s20, %s160_s27  }
   0xf   : > { %s6875_s30 = scalar_select %p5663_p8, 1, 0 }
  0x10   : > { %p5671_p10 = pnand %p4166_p6, %p184_p9  ;;  %p5675_p11 = scmp.eq.s32.totalorder %s4164_s24, 0 }
  0x11   : > { %s5579_s9 = smov [#allocation3]   ;;  %s5467_s14 = scalar_lea.hbm %s6865_s1, 9216 }
  0x12   : > { %s6876_s7 = scalar_select %p5671_p10, 1, 0 }
  0x13   : > { %s6877_s8 = scalar_select %p5675_p11, 1, 0 }
  0x14   : > { %p5293_p12 = pneg %p5671_p10  ;;  %s198_s10 = sshll.u32 %s5579_s9, 4  ;;  %s199_s10 = int_to_ptr.vmem [resolvable:$true] %s198_s10 }
  0x15   : > { %p5468_p0 = scmp.ne.s32.totalorder %s6865_s1, %s5467_s14  ;;  %p5474_p5 = scmp.lt.u32.totalorder %s5467_s14, %s6865_s1 }
  0x16   : > { %p5683_p13 = pnand %p5675_p11, %p5293_p12 }
  0x18   : > { %p5469_p1 = pneg %p5683_p13 }
  0x1a   : > { %p5470_p2 = pnand %p5469_p1, %p5468_p0 }
  0x1c   : > { %p5471_p3 = pneg %p5470_p2 }
  0x1e   : > { %p5476_p6 = pnand %p5474_p5, %p5471_p3 }
  0x20   : > { %5479 = shalt.err (!%p5476_p6)
}
  0x21   : > { %s5480_s25 = scalar_lea.vmem %s199_s10, 9216  ;;  %p5488_p8 = scmp.lt.s32.totalorder %s199_s10, %s199_s10 }
  0x22   : > { %p5481_p7 = scmp.ne.s32.totalorder %s199_s10, %s5480_s25  ;;  %p5489_p4 = scmp.lt.s32.totalorder %s5480_s25, %s5480_s25 }
  0x24   : > { %p5483_p9 = pnand %p5481_p7, %p5469_p1  ;;  %p5490_p11 = por %p5489_p4, %p5488_p8 }
  0x26   : > { %p5484_p12 = pneg %p5483_p9 }
  0x28   : > { %p5491_p10 = pnand %p5490_p11, %p5484_p12 }
  0x2a   : > { %5494 = shalt.err (!%p5491_p10)
}
  0x2b   : > { %s5580_s27 = smov 64   ;;  %s5581_s29 = smov 4  }
  0x2c   : > { %5296 = dma.hbm_to_vmem [thread:$0]  (!%p5683_p13), %s6865_s1, 9216, %s199_s10, [#allocation4], %s5580_s27, %s5580_s27, %s5581_s29  }
  0x2d   : > { %p6879_p0 = scmp.ne.s32.totalorder %s6876_s7, 0 }
  0x2f   : > { %234 = sbr.rel (%p6879_p0) target bundleno = 611 (0x263), region = 40 }
  0x36   : > { %p6880_p2 = scmp.ne.s32.totalorder %s6877_s8, 0 }
  0x38   : > { %5548 = dma.done.wait (%p6880_p2), [#allocation4], 9216  }
  0x39   : > { %5550 = vsyncadd (%p6880_p2), [#allocation4], 4294958080  ;;  %v5582_v0 = vmov 0   ;;  %v5360_v1 = vld [vmem:[#allocation3 + $0x100] sm:$0xff]   ;;  %v5362_v3 = vld [vmem:[#allocation3 + $0x108] sm:$0xff]   ;;  %p265_p4 = scmp.lt.s32.totalorder %s5569_s21, 1 }
  0x3a   : > { %279 = vst [vmem:[#allocation2 + $0x8] sm:$0xff] %v5582_v0  ;;  %278 = vst [vmem:[#allocation2] sm:$0xff] %v5582_v0  ;;  %5359 = vset.pattern.permute.xlu1 %v5582_v0  ;;  %5358 = vset.pattern.permute.xlu0 %v5582_v0  ;;  %v5709_v2 = vld [vmem:[#allocation3 + $0x40] sm:$0xff]   ;;  %v5712_v4 = vld [vmem:[#allocation3 + $0x48] sm:$0xff]   ;;  %vm515_vm0 = vcmask 1043456   ;;  %s262_s9 = sand.u32 1, %s5561_s19  }
  0x3b   : > { %295 = vst [vmem:[#allocation2 + $0x88] sm:$0xff] %v5582_v0  ;;  %296 = vst [vmem:[#allocation2 + $0x90] sm:$0xff] %v5582_v0  ;;  %4647 = vmatprep.subr.bf16.mxu1 %v5360_v1  ;;  %4695 = vmatprep.subr.bf16.mxu0 %v5709_v2  ;;  %v5364_v5 = vld [vmem:[#allocation3 + $0x110] sm:$0xff]   ;;  %s266_s7 = scalar_select %p265_p4, %s5569_s21, 1  ;;  %v5366_v7 = vld [vmem:[#allocation3 + $0x118] sm:$0xff]  }
  0x3c   : > { %4648 = vmatpush3.bf16.msra.mxu1 %v5360_v1  ;;  %4696 = vmatpush3.bf16.msra.mxu0 %v5709_v2  ;;  %v5717_v6 = vld [vmem:[#allocation3 + $0x50] sm:$0xff]   ;;  %v5722_v8 = vld [vmem:[#allocation3 + $0x58] sm:$0xff]   ;;  %v5368_v9 = vld [vmem:[#allocation3 + $0x120] sm:$0xff]   ;;  %vm2707_vm1 = vsmask.f32 3328  ;;  %s4335_s11 = sshll.u32 %s5569_s21, 11 }
  0x3d   : > { %4649 = vmatprep.subr.bf16.mxu1 %v5362_v3  ;;  %4697 = vmatprep.subr.bf16.mxu0 %v5712_v4  ;;  %s4302_s8 = sshll.u32 %s266_s7, 7  ;;  %v5726_v10 = vld [vmem:[#allocation3 + $0x60] sm:$0xff]   ;;  %v5370_v11 = vld [vmem:[#allocation3 + $0x128] sm:$0xff]   ;;  %v5372_v16 = vld [vmem:[#allocation3 + $0x130] sm:$0xff]   ;;  %vm1371_vm2 = vsmask.f32 4352  ;;  %s6810_s16 = scalar_lea.hbm %s6869_s5, %s4335_s11 }
  0x3e   : > { %s5731_s13 = scalar_lea.vmem %s6864_s0, %s4302_s8  ;;  %v5735_v12 = vld [vmem:[#allocation3 + $0x68] sm:$0xff]   ;;  %v5746_v17 = vld [vmem:[#allocation3 + $0x70] sm:$0xff]   ;;  %v5374_v19 = vld [vmem:[#allocation3 + $0x138] sm:$0xff]   ;;  %s4172_s8 = sshll.u32 %s262_s9, 7 }
  0x3f   : > { %v5376_v13 = vld [vmem:[%s5731_s13] ss:$0 sps:$4 sm:$0xff]   ;;  %v5739_v14 = vld [vmem:[%s5731_s13 + $0x4] sm:$0xff]   ;;  %v5742_v15 = vld [vmem:[%s5731_s13 + $0xc] sm:$0xff]   ;;  %s6677_s10 = scalar_lea.vmem [#allocation6], %s4172_s8  ;;  %s6818_s21 = scalar_lea.sflag [#allocation5], %s262_s9 }
  0x40   : > { %4650 = vmatpush3.bf16.msra.mxu1 %v5362_v3  ;;  %4698 = vmatpush3.bf16.msra.mxu0 %v5712_v4  ;;  %427 = vst [vmem:[#allocation2 + $0x8] sm:$0xf0] %v5376_v13  ;;  %428 = vst [vmem:[#allocation2 + $0x10] sm:$0xff] %v5739_v14  ;;  %v5751_v20 = vld [vmem:[%s5731_s13 + $0x14] sm:$0xff]   ;;  %v5754_v21 = vld [vmem:[%s5731_s13 + $0x1c] sm:$0xff]   ;;  %v517_v23 = vrot.slane %v5739_v14, 4 }
  0x41   : > { %4651 = vmatprep.subr.bf16.mxu1 %v5364_v5  ;;  %4699 = vmatprep.subr.bf16.mxu0 %v5717_v6  ;;  %v444_v18 = vld [vmem:[#allocation2] sm:$0xf0]  ;;  %429 = vst [vmem:[#allocation2 + $0x18] sm:$0xff] %v5742_v15  ;;  %v5757_v22 = vld [vmem:[#allocation3 + $0x78] sm:$0xff]   ;;  %430 = vst [vmem:[#allocation2 + $0x20] sm:$0xff] %v5751_v20  ;;  %v5767_v29 = vrot.slane %v5742_v15, 4 }
  0x42   : > { %v777_v24 = vrot.slane %v444_v18, 4  ;;  %431 = vst [vmem:[#allocation2 + $0x28] sm:$0xff] %v5754_v21  ;;  %v5770_v30 = vld [vmem:[%s5731_s13 + $0x24] sm:$0xff]   ;;  %v5773_v31 = vld [vmem:[%s5731_s13 + $0x2c] sm:$0xff]   ;;  %v5379_v34 = vld [vmem:[#allocation3 + $0x1c0] sm:$0xff]   ;;  %v521_v35 = vrot.slane %v5751_v20, 4 }
  0x43   : > { %432 = vst [vmem:[#allocation2 + $0x30] sm:$0xff] %v5770_v30  ;;  %433 = vst [vmem:[#allocation2 + $0x38] sm:$0xff] %v5773_v31  ;;  %v520_v36 = vsel %vm515_vm0, %v517_v23, %v5767_v29  ;;  %v5785_v37 = vld [vmem:[%s5731_s13 + $0x34] sm:$0xff]   ;;  %v5791_v39 = vld [vmem:[%s5731_s13 + $0x3c] sm:$0xff]   ;;  %v1381_v43 = vshrl.u32 %v5739_v14, 16  ;;  %v523_v44 = vrot.slane %v5754_v21, 4 }
  0x44   : > { %4652 = vmatpush3.bf16.msra.mxu1 %v5364_v5  ;;  %4700 = vmatpush3.bf16.msra.mxu0 %v5717_v6  ;;  %v5380_v40 = vld [vmem:[#allocation3 + $0x1c8] sm:$0xff]   ;;  %v5795_v41 = vsel %vm515_vm0, %v5767_v29, %v521_v35  ;;  %434 = vst [vmem:[#allocation2 + $0x40] sm:$0xff] %v5785_v37  ;;  %435 = vst [vmem:[#allocation2 + $0x48] sm:$0xff] %v5791_v39  ;;  %v525_v47 = vrot.slane %v5770_v30, 4  ;;  %v5808_v48 = vld [vmem:[%s5731_s13 + $0x4c] sm:$0xff]   ;;  %v1384_v49 = vshll.u32 %v5739_v14, 16 }
  0x45   : > { %4653 = vmatprep.subr.bf16.mxu1 %v5366_v7  ;;  %4701 = vmatprep.subr.bf16.mxu0 %v5722_v8  ;;  %v5803_v45 = vld [vmem:[%s5731_s13 + $0x44] sm:$0xff]   ;;  %437 = vst [vmem:[#allocation2 + $0x58] sm:$0xff] %v5808_v48  ;;  %v5815_v51 = vld [vmem:[%s5731_s13 + $0x54] sm:$0xff]   ;;  %v5818_v53 = vsel %vm515_vm0, %v521_v35, %v523_v44  ;;  %v5822_v54 = vld [vmem:[%s5731_s13 + $0x5c] sm:$0xff]   ;;  %v2716_v58 = vrot.slane %v1381_v43, 4  ;;  %v527_v63 = vrot.slane %v5773_v31, 4 }
  0x46   : > { %v5383_v50 = vld [vmem:[#allocation3 + $0x1d0] sm:$0xff]   ;;  %436 = vst [vmem:[#allocation2 + $0x50] sm:$0xff] %v5803_v45  ;;  %v5384_v56 = vld [vmem:[#allocation3 + $0x1d8] sm:$0xff]   ;;  %v5825_v57 = vsel %vm515_vm0, %v523_v44, %v525_v47  ;;  %438 = vst [vmem:[#allocation2 + $0x60] sm:$0xff] %v5815_v51  ;;  %v2717_v62 = vrot.slane %v1384_v49, 5  ;;  %v529_v1 = vrot.slane %v5785_v37, 4 }
  0x47   : > { %v478_v25 = vld [vmem:[#allocation2 + $0x8] sm:$0xf0]  ;;  %439 = vst [vmem:[#allocation2 + $0x68] sm:$0xff] %v5822_v54  ;;  %v5833_v59 = vld [vmem:[%s5731_s13 + $0x64] sm:$0xff]   ;;  %v5387_v0 = vld [vmem:[#allocation3 + $0x1e0] sm:$0xff]   ;;  %v531_v13 = vrot.slane %v5791_v39, 4 }
  0x48   : > { %4654 = vmatpush3.bf16.msra.mxu1 %v5366_v7  ;;  %4702 = vmatpush3.bf16.msra.mxu0 %v5722_v8  ;;  %v5763_v26 = vld [vmem:[#allocation2 + $0x8] sm:$0xff]  ;;  %v516_v27 = vrot.slane %v478_v25, 4  ;;  %v2709_v42 = vshrl.u32 %v478_v25, 16  ;;  %v2712_v46 = vshll.u32 %v478_v25, 16  ;;  %440 = vst [vmem:[#allocation2 + $0x70] sm:$0xff] %v5833_v59  ;;  %v5851_v3 = vor.u32 %v2717_v62, %v2716_v58  ;;  %v2422_v58 = vld [vmem:[%s6867_s3 + $0x38] sm:$0xff] }
  0x49   : > { %4655 = vmatprep.subr.bf16.mxu1 %v5368_v9  ;;  %4703 = vmatprep.subr.bf16.mxu0 %v5726_v10  ;;  %v778_v28 = vrot.slane %v5763_v26, 4  ;;  %v5837_v60 = vld [vmem:[%s5731_s13 + $0x6c] sm:$0xff]   ;;  %v5862_v7 = vsel %vm515_vm0, %v525_v47, %v527_v63  ;;  %p6945_p10 = scmp.ne.s32.totalorder %s6874_s28, 0  ;;  %s5583_s24 = smov [#allocation6]  }
  0x4a   : > { %v518_v32 = vsel %vm515_vm0, %v516_v27, %v517_v23  ;;  %v2711_v52 = vrot.slane %v2709_v42, 4  ;;  %v2714_v55 = vrot.slane %v2712_v46, 5  ;;  %441 = vst [vmem:[#allocation2 + $0x78] sm:$0xff] %v5837_v60  ;;  %v5391_v18 = vld [vmem:[#allocation3 + $0x1f0] sm:$0xff]   ;;  %v537_v27 = vrot.slane %v5815_v51, 4  ;;  %v2418_v42 = vld [vmem:[%s6867_s3 + $0x18] sm:$0xff] }
  0x4b   : > { %v779_v33 = vsel %vm515_vm0, %v777_v24, %v778_v28  ;;  %4663 = vmatprep.mubr.bf16.mxu1 %v518_v32  ;;  %v780_v38 = vsel %vm515_vm0, %v778_v28, %v517_v23  ;;  %v5392_v24 = vld [vmem:[#allocation3 + $0x1f8] sm:$0xff]   ;;  %v5395_v28 = vld [vmem:[#allocation3 + $0x140] sm:$0xff]   ;;  %v5401_v35 = vld [vmem:[#allocation3 + $0x150] sm:$0xff]   ;;  %v5929_v44 = vrot.slane %v5837_v60, 4  ;;  %s5499_s25 = sshll.u32 %s5583_s24, 4  ;;  %s5500_s25 = int_to_ptr.vmem [resolvable:$false] %s5499_s25 }
  0x4c   : > { %4656 = vmatpush3.bf16.msra.mxu1 %v5368_v9  ;;  %4704 = vmatpush3.bf16.msra.mxu0 %v5726_v10  ;;  %v2715_v61 = vor.u32 %v2714_v55, %v2711_v52  ;;  %v5865_v9 = vsel %vm515_vm0, %v527_v63, %v529_v1  ;;  %v2416_v46 = vld [vmem:[%s6867_s3 + $0x8] sm:$0xff]  ;;  %s5501_s27 = scalar_lea.vmem %s5500_s25, 4096 }
  0x4d   : > { %4657 = vmatprep.subr.bf16.mxu1 %v5370_v11  ;;  %4705 = vmatprep.subr.bf16.mxu0 %v5735_v12  ;;  %v2420_v52 = vld [vmem:[%s6867_s3 + $0x28] sm:$0xff] }
  0x4e   : > { %4711 = vmatprep.mubr.bf16.mxu0 %v779_v33  ;;  %v5859_v5 = vsel %vm2707_vm1, %v2715_v61, %v5851_v3  ;;  %v5398_v33 = vld [vmem:[#allocation3 + $0x148] sm:$0xff]   ;;  %v2421_v61 = vld [vmem:[%s6867_s3 + $0x30] sm:$0xff]  ;;  %v5412_v62 = vld [vmem:[#allocation3 + $0x170] sm:$0xff]  }
  0x4f   : > { %v2424_v63 = vld [vmem:[%s6867_s3 + $0x48] sm:$0xff] }
  0x50   : > { %4658 = vmatpush3.bf16.msra.mxu1 %v5370_v11  ;;  %4706 = vmatpush3.bf16.msra.mxu0 %v5735_v12  ;;  %v5388_v11 = vld [vmem:[#allocation3 + $0x1e8] sm:$0xff]  }
  0x51   : > { %4659 = vmatprep.subr.bf16.mxu1 %v5372_v16  ;;  %4707 = vmatprep.subr.bf16.mxu0 %v5746_v17 }
  0x54   : > { %4660 = vmatpush3.bf16.msra.mxu1 %v5372_v16  ;;  %4708 = vmatpush3.bf16.msra.mxu0 %v5746_v17  ;;  %v533_v16 = vrot.slane %v5803_v45, 4 }
  0x55   : > { %4661 = vmatprep.subr.bf16.mxu1 %v5374_v19  ;;  %4709 = vmatprep.subr.bf16.mxu0 %v5757_v22 }
  0x56   : > { %v5881_v23 = vsel %vm515_vm0, %v531_v13, %v533_v16 }
  0x58   : > { %4662 = vmatpush3.bf16.msra.mxu1 %v5374_v19  ;;  %4710 = vmatpush3.bf16.msra.mxu0 %v5757_v22 }
  0x59   : > { %5079 = vmatprep.subr.bf16.mxu1 %v5709_v2  ;;  %4743 = vmatprep.subr.bf16.mxu0 %v5379_v34 }
  0x5b   : > { %4664 = vmatmul.mubr.bf16.vlgmr.msra.gmra.mrb[0].mxu1 %v520_v36  ;;  %4712 = vmatmul.mubr.bf16.vlgmr.msra.gmra.mrb[0].mxu0 %v780_v38 }
  0x5c   : > { %5087 = vmatpush3.bf16.msra.mxu1 %v5709_v2  ;;  %4744 = vmatpush3.bf16.msra.mxu0 %v5379_v34  ;;  %v5849_v2 = vld [vmem:[%s5731_s13 + $0x74] sm:$0xff]   ;;  %v541_v34 = vrot.slane %v5833_v59, 4 }
  0x5d   : > { %4667 = vmatprep.mubr.bf16.mxu1 %v5795_v41  ;;  %4745 = vmatprep.subr.bf16.mxu0 %v5380_v40  ;;  %442 = vst [vmem:[#allocation2 + $0x80] sm:$0xff] %v5849_v2  ;;  %v5936_v47 = vrot.slane %v5849_v2, 4  ;;  %v5415_v2 = vld [vmem:[#allocation3 + $0x178] sm:$0xff]  }
  0x5e   : > { %4715 = vmatprep.mubr.bf16.mxu0 %v520_v36  ;;  %5080 = vmatprep.subr.bf16.mxu1 %v5712_v4  ;;  %v2415_v36 = vld [vmem:[%s6867_s3] sm:$0xff] }
  0x5f   : > { %2449 = vperm.xlu0 %5358, %v2415_v36   ;;  %v5951_v55 = vsel %vm515_vm0, %v5929_v44, %v5936_v47 }
  0x60   : > { %5088 = vmatpush3.bf16.msra.mxu1 %v5712_v4  ;;  %4746 = vmatpush3.bf16.msra.mxu0 %v5380_v40  ;;  %v5403_v4 = vld [vmem:[%s5731_s13 + $0x7c] ss:$0 sps:$4 sm:$0xff]   ;;  %s4066_s13 = sshll.u32 %s6677_s10, 4  ;;  %s6812_s13 = int_to_ptr.vmem [resolvable:$true] %s4066_s13 }
  0x61   : > { %5081 = vmatprep.subr.bf16.mxu1 %v5717_v6  ;;  %4747 = vmatprep.subr.bf16.mxu0 %v5383_v50  ;;  %443 = vst [vmem:[#allocation2 + $0x88] sm:$0xf] %v5403_v4  ;;  %v2426_v4 = vld [vmem:[%s6867_s3 + $0x58] sm:$0xff]  ;;  %s5495_s17 = scalar_lea.vmem %s6812_s13, 2048  ;;  %p5502_p1 = scmp.lt.s32.totalorder %s6812_s13, %s5500_s25 }
  0x62   : > { %p5496_p8 = scmp.ne.s32.totalorder %s6812_s13, %s5495_s17  ;;  %p5503_p3 = scmp.lt.s32.totalorder %s5501_s27, %s5495_s17 }
  0x63   : > { %4668 = vmatmul.mubr.bf16.gmra.mrb[4].mxu1 %v5818_v53  ;;  %4716 = vmatmul.mubr.bf16.gmra.mrb[4].mxu0 %v5795_v41 }
  0x64   : > { %4671 = vmatprep.mubr.bf16.mxu1 %v5825_v57  ;;  %4748 = vmatpush3.bf16.msra.mxu0 %v5383_v50  ;;  %v5406_v50 = vld [vmem:[#allocation3 + $0x160] sm:$0xff]   ;;  %p5497_p11 = pnand %p5496_p8, %p6945_p10  ;;  %p5504_p5 = por %p5503_p3, %p5502_p1 }
  0x65   : > { %4719 = vmatprep.mubr.bf16.mxu0 %v5818_v53  ;;  %4749 = vmatprep.subr.bf16.mxu0 %v5384_v56 }
  0x66   : > { %5089 = vmatpush3.bf16.msra.mxu1 %v5717_v6  ;;  %v995_v6 = vld [vmem:[#allocation2 + $0x10] sm:$0xf0]  ;;  %2454 = vperm.xlu0 %5358, %v2416_v46   ;;  %p5498_p13 = pneg %p5497_p11 }
  0x67   : > { %5082 = vmatprep.subr.bf16.mxu1 %v5722_v8  ;;  %v1046_v19 = vrot.slane %v995_v6, 4  ;;  %v5985_v6 = vld [vmem:[#allocation3 + $0x80] sm:$0xff]   ;;  %v2433_v46 = vld [vmem:[%s6867_s3 + $0x90] sm:$0xff] }
  0x68   : > { %4750 = vmatpush3.bf16.msra.mxu0 %v5384_v56  ;;  %v5953_v56 = vld [vmem:[#allocation2 + $0x88] sm:$0xf]  ;;  %p5505_p6 = pnand %p5504_p5, %p5498_p13 }
  0x69   : > { %4751 = vmatprep.subr.bf16.mxu0 %v5387_v0  ;;  %v1048_v25 = vsel %vm515_vm0, %v1046_v19, %v5767_v29  ;;  %v547_v59 = vrot.slane %v5953_v56, 4  ;;  %v2427_v19 = vld [vmem:[%s6867_s3 + $0x60] sm:$0xff] }
  0x6a   : > { %5090 = vmatpush3.bf16.msra.mxu1 %v5722_v8  ;;  %v5878_v8 = vsel %vm515_vm0, %v529_v1, %v531_v13  ;;  %v2423_v1 = vld [vmem:[%s6867_s3 + $0x40] sm:$0xff]  ;;  %v2428_v13 = vld [vmem:[%s6867_s3 + $0x68] sm:$0xff] }
  0x6b   : > { %4672 = vmatmul.mubr.bf16.gmra.mrb[8].mxu1 %v5862_v7  ;;  %5083 = vmatprep.subr.bf16.mxu1 %v5726_v10 }
  0x6c   : > { %4720 = vmatmul.mubr.bf16.gmra.mrb[8].mxu0 %v5825_v57  ;;  %4675 = vmatprep.mubr.bf16.mxu1 %v5865_v9 }
  0x6d   : > { %4752 = vmatpush3.bf16.msra.mxu0 %v5387_v0  ;;  %4723 = vmatprep.mubr.bf16.mxu0 %v5862_v7  ;;  %v548_v0 = vsel %vm515_vm0, %v5936_v47, %v547_v59 }
  0x6e   : > { %4753 = vmatprep.subr.bf16.mxu0 %v5388_v11  ;;  %5091 = vmatpush3.bf16.msra.mxu1 %v5726_v10  ;;  %v535_v10 = vrot.slane %v5808_v48, 4 }
  0x6f   : > { %5084 = vmatprep.subr.bf16.mxu1 %v5735_v12 }
  0x70   : > { %v5897_v29 = vsel %vm515_vm0, %v533_v16, %v535_v10  ;;  %v5900_v32 = vsel %vm515_vm0, %v535_v10, %v537_v27  ;;  %v1383_v16 = vrot.slane %v1381_v43, 3  ;;  %v2430_v43 = vld [vmem:[%s6867_s3 + $0x78] sm:$0xff] }
  0x71   : > { %4754 = vmatpush3.bf16.msra.mxu0 %v5388_v11  ;;  %v1761_v11 = vshll.u32 %v5763_v26, 16 }
  0x72   : > { %4755 = vmatprep.subr.bf16.mxu0 %v5391_v18  ;;  %5092 = vmatpush3.bf16.msra.mxu1 %v5735_v12  ;;  %v5894_v12 = vld [vmem:[#allocation3 + $0xc0] sm:$0xff]  }
  0x73   : > { %4676 = vmatmul.mubr.bf16.gmra.mrb[12].mxu1 %v5878_v8  ;;  %5085 = vmatprep.subr.bf16.mxu1 %v5746_v17 }
  0x74   : > { %4724 = vmatmul.mubr.bf16.gmra.mrb[12].mxu0 %v5865_v9  ;;  %4679 = vmatprep.mubr.bf16.mxu1 %v5881_v23 }
  0x75   : > { %4756 = vmatpush3.bf16.msra.mxu0 %v5391_v18  ;;  %4759 = vmatprep.mubr.bf16.mxu0 %v1048_v25  ;;  %v1386_v18 = vrot.slane %v1384_v49, 4  ;;  %v2429_v49 = vld [vmem:[%s6867_s3 + $0x70] sm:$0xff] }
  0x76   : > { %4757 = vmatprep.subr.bf16.mxu0 %v5392_v24  ;;  %5093 = vmatpush3.bf16.msra.mxu1 %v5746_v17  ;;  %v539_v17 = vrot.slane %v5822_v54, 4  ;;  %v2419_v54 = vld [vmem:[%s6867_s3 + $0x20] sm:$0xff] }
  0x77   : > { %5086 = vmatprep.subr.bf16.mxu1 %v5757_v22  ;;  %2469 = vperm.xlu0 %5358, %v2419_v54   ;;  %v6004_v14 = vor.u32 %v1386_v18, %v1383_v16  ;;  %v460_v54 = vld [vmem:[#allocation2 + $0x80] sm:$0xf]  ;;  %v1399_v18 = vshrl.u32 %v5751_v20, 16 }
  0x78   : > { %v5917_v38 = vsel %vm515_vm0, %v537_v27, %v539_v17  ;;  %v5920_v40 = vsel %vm515_vm0, %v539_v17, %v541_v34  ;;  %v3019_v27 = vrot.slane %v1761_v11, 5  ;;  %v2432_v17 = vld [vmem:[%s6867_s3 + $0x88] sm:$0xff]  ;;  %v1771_v16 = vshll.u32 %v460_v54, 16 }
  0x79   : > { %4758 = vmatpush3.bf16.msra.mxu0 %v5392_v24  ;;  %v1763_v24 = vrot.slane %v1761_v11, 4  ;;  %v2437_v11 = vld [vmem:[%s6867_s3 + $0xb0] sm:$0xff] }
  0x7a   : > { %4935 = vmatprep.subr.bf16.mxu0 %v5395_v28  ;;  %5094 = vmatpush3.bf16.msra.mxu1 %v5757_v22  ;;  %v2417_v22 = vld [vmem:[%s6867_s3 + $0x10] sm:$0xff] }
  0x7b   : > { %4680 = vmatmul.mubr.bf16.gmra.mrb[16].mxu1 %v5897_v29  ;;  %4791 = vmatprep.subr.bf16.mxu1 %v5894_v12 }
  0x7c   : > { %4760 = vmatmul.mubr.bf16.vlgmr.msra.gmra.mrb[0].mxu0 %v5795_v41  ;;  %4683 = vmatprep.mubr.bf16.mxu1 %v5900_v32  ;;  %v5404_v41 = vld [vmem:[#allocation3 + $0x158] sm:$0xff]  }
  0x7d   : > { %4936 = vmatpush3.bf16.msra.mxu0 %v5395_v28  ;;  %4763 = vmatprep.mubr.bf16.mxu0 %v5818_v53  ;;  %v5943_v53 = vsel %vm515_vm0, %v541_v34, %v5929_v44 }
  0x7e   : > { %4937 = vmatprep.subr.bf16.mxu0 %v5398_v33  ;;  %2459 = vperm.xlu1 %5359, %v2417_v22   ;;  %v6031_v22 = vld [vmem:[#allocation2 + $0x88] sm:$0xff] }
  0x7f   : > { %2479 = vperm.xlu0 %5358, %v2421_v61   ;;  %v1498_v61 = vshrl.u32 %v5837_v60, 16 }
  0x81   : > { %4938 = vmatpush3.bf16.msra.mxu0 %v5398_v33  ;;  %v1353_v33 = vld [vmem:[#allocation2 + $0x8] sm:$0xf8] }
  0x82   : > { %4939 = vmatprep.subr.bf16.mxu0 %v5401_v35  ;;  %2464 = vperm.xlu1 %5359, %v2418_v42   ;;  %v1373_v36 = vshrl.u32 %v1353_v33, 16  ;;  %v2434_v42 = vld [vmem:[%s6867_s3 + $0x98] sm:$0xff] }
  0x83   : > { %4684 = vmatmul.mubr.bf16.gmra.mrb[20].mxu1 %v5917_v38  ;;  %2489 = vperm.xlu0 %5358, %v2423_v1  }
  0x84   : > { %4764 = vmatmul.mubr.bf16.gmra.mrb[4].mxu0 %v5825_v57  ;;  %4687 = vmatprep.mubr.bf16.mxu1 %v5920_v40  ;;  %v5409_v57 = vld [vmem:[#allocation3 + $0x168] sm:$0xff]  }
  0x85   : > { %4767 = vmatprep.mubr.bf16.mxu0 %v5862_v7  ;;  %4940 = vmatpush3.bf16.msra.mxu0 %v5401_v35  ;;  %v1758_v7 = vshrl.u32 %v5763_v26, 16  ;;  %v5410_v35 = vld [vmem:[#allocation3 + $0xd8] sm:$0xff]  }
  0x86   : > { %4941 = vmatprep.subr.bf16.mxu0 %v5404_v41  ;;  %2474 = vperm.xlu1 %5359, %v2420_v52   ;;  %v5413_v52 = vld [vmem:[#allocation3 + $0xe8] sm:$0xff]  }
  0x87   : > { %v1760_v26 = vrot.slane %v1758_v7, 3  ;;  %v3018_v10 = vrot.slane %v1758_v7, 4  ;;  %v781_v7 = vrot.slane %v460_v54, 4 }
  0x89   : > { %4942 = vmatpush3.bf16.msra.mxu0 %v5404_v41  ;;  %v6009_v25 = vor.u32 %v1763_v24, %v1760_v26  ;;  %v6013_v28 = vor.u32 %v3019_v27, %v3018_v10  ;;  %v1376_v41 = vshll.u32 %v1353_v33, 16  ;;  %v1773_v24 = vrot.slane %v1771_v16, 4  ;;  %v5416_v33 = vld [vmem:[#allocation3 + $0xf8] sm:$0xff]  }
  0x8a   : > { %4943 = vmatprep.subr.bf16.mxu0 %v5406_v50  ;;  %2484 = vperm.xlu1 %5359, %v2422_v58   ;;  %v1375_v58 = vrot.slane %v1373_v36, 3 }
  0x8b   : > { %4688 = vmatmul.mubr.bf16.gmra.mrb[24].mxu1 %v5943_v53  ;;  %v6029_v34 = vsel %vm2707_vm1, %v6013_v28, %v5851_v3  ;;  %v1378_v59 = vrot.slane %v1376_v41, 4 }
  0x8c   : > { %4768 = vmatmul.mubr.bf16.gmra.mrb[8].mxu0 %v5865_v9  ;;  %4691 = vmatprep.mubr.bf16.mxu1 %v5951_v55  ;;  %v2425_v9 = vld [vmem:[%s6867_s3 + $0x50] sm:$0xff] }
  0x8d   : > { %4771 = vmatprep.mubr.bf16.mxu0 %v5878_v8  ;;  %4944 = vmatpush3.bf16.msra.mxu0 %v5406_v50  ;;  %v5411_v50 = vld [vmem:[#allocation3 + $0xe0] sm:$0xff]  }
  0x8e   : > { %4945 = vmatprep.subr.bf16.mxu0 %v5409_v57  ;;  %2494 = vperm.xlu1 %5359, %v2424_v63   ;;  %v2435_v63 = vld [vmem:[%s6867_s3 + $0xa0] sm:$0xff] }
  0x8f   : > { %2499 = vperm.xlu0 %5358, %v2425_v9  }
  0x91   : > { %4946 = vmatpush3.bf16.msra.mxu0 %v5409_v57  ;;  %v1011_v57 = vld [vmem:[#allocation2 + $0x90] sm:$0xf] }
  0x92   : > { %4947 = vmatprep.subr.bf16.mxu0 %v5412_v62  ;;  %2504 = vperm.xlu1 %5359, %v2426_v4   ;;  %v1393_v4 = vshll.u32 %v5742_v15, 16  ;;  %v1077_v9 = vrot.slane %v1011_v57, 4  ;;  %v2441_v57 = vld [vmem:[%s6867_s3 + $0xd0] sm:$0xff] }
  0x93   : > { %4692 = vmatmul.mubr.bf16.gmra.mrb[28].mxu1 %v548_v0  ;;  %2509 = vperm.xlu0 %5358, %v2427_v19   ;;  %v1390_v0 = vshrl.u32 %v5742_v15, 16  ;;  %v1768_v15 = vshrl.u32 %v460_v54, 16  ;;  %v1402_v19 = vshll.u32 %v5751_v20, 16  ;;  %v2439_v20 = vld [vmem:[%s6867_s3 + $0xc0] sm:$0xff] }
  0x94   : > { %4772 = vmatmul.mubr.bf16.gmra.mrb[12].mxu0 %v5881_v23  ;;  %4727 = vmatprep.mubr.bf16.mxu1 %v5878_v8  ;;  %v5407_v8 = vld [vmem:[#allocation3 + $0xc8] sm:$0xff]   ;;  %v2721_v27 = vrot.slane %v1393_v4, 5 }
  0x95   : > { %4775 = vmatprep.mubr.bf16.mxu0 %v5897_v29  ;;  %4948 = vmatpush3.bf16.msra.mxu0 %v5412_v62  ;;  %v2436_v62 = vld [vmem:[%s6867_s3 + $0xa8] sm:$0xff]  ;;  %v1392_v26 = vrot.slane %v1390_v0, 3  ;;  %v2720_v10 = vrot.slane %v1390_v0, 4  ;;  %v1404_v36 = vrot.slane %v1402_v19, 4  ;;  %v2725_v41 = vrot.slane %v1402_v19, 5 }
  0x96   : > { %4949 = vmatprep.subr.bf16.mxu0 %v5415_v2  ;;  %2514 = vperm.xlu1 %5359, %v2428_v13   ;;  %v1429_v19 = vshll.u32 %v5773_v31, 16 }
  0x97   : > { %2519 = vperm.xlu0 %5358, %v2429_v49   ;;  %v1395_v49 = vrot.slane %v1393_v4, 4  ;;  %v2722_v54 = vor.u32 %v2721_v27, %v2720_v10  ;;  %v2445_v10 = vld [vmem:[%s6867_s3 + $0xf0] sm:$0xff]  ;;  %v5422_v27 = vld [vmem:[#allocation3 + $0x90] sm:$0xff]  }
  0x99   : > { %4950 = vmatpush3.bf16.msra.mxu0 %v5415_v2  ;;  %v2438_v2 = vld [vmem:[%s6867_s3 + $0xb8] sm:$0xff] }
  0x9a   : > { %4983 = vmatprep.subr.bf16.mxu0 %v5985_v6  ;;  %2524 = vperm.xlu1 %5359, %v2430_v43   ;;  %v782_v43 = vsel %vm515_vm0, %v5929_v44, %v781_v7  ;;  %v2724_v44 = vrot.slane %v1399_v18, 4 }
  0x9b   : > { %4728 = vmatmul.mubr.bf16.vlgmr.msra.gmra.mrb[16].mxu1 %v5881_v23  ;;  %v5408_v23 = vld [vmem:[#allocation3 + $0xd0] sm:$0xff]  }
  0x9c   : > { %4776 = vmatmul.mubr.bf16.gmra.mrb[16].mxu0 %v5900_v32  ;;  %4792 = vmatpush3.bf16.msra.mxu1 %v5894_v12  ;;  %v6018_v12 = vsel %vm1371_vm2, %v6009_v25, %v6004_v14 }
  0x9d   : > { %4793 = vmatprep.subr.bf16.mxu1 %v5407_v8  ;;  %4731 = vmatprep.mubr.bf16.mxu1 %v5897_v29  ;;  %v2431_v29 = vld [vmem:[%s6867_s3 + $0x80] sm:$0xff] }
  0x9e   : > { %4779 = vmatprep.mubr.bf16.mxu0 %v5917_v38  ;;  %2534 = vperm.xlu1 %5359, %v2432_v17  }
  0x9f   : > { %2529 = vperm.xlu0 %5358, %v2431_v29  }
  0xa0   : > { %4794 = vmatpush3.bf16.msra.mxu1 %v5407_v8  ;;  %v1770_v8 = vrot.slane %v1768_v15, 3 }
  0xa1   : > { %4795 = vmatprep.subr.bf16.mxu1 %v5408_v23 }
  0xa2   : > { %2544 = vperm.xlu1 %5359, %v2434_v42   ;;  %v1774_v29 = vor.u32 %v1773_v24, %v1770_v8  ;;  %v1408_v42 = vshrl.u32 %v5754_v21, 16  ;;  %v5421_v24 = vld [vmem:[#allocation3 + $0x10] sm:$0xff]  }
  0xa3   : > { %4732 = vmatmul.mubr.bf16.gmra.mrb[20].mxu1 %v5900_v32  ;;  %v1075_v32 = vrot.slane %v6031_v22, 4  ;;  %2539 = vperm.xlu0 %5358, %v2433_v46   ;;  %v1401_v22 = vrot.slane %v1399_v18, 3  ;;  %v1411_v46 = vshll.u32 %v5754_v21, 16  ;;  %v5417_v21 = vld [vmem:[#allocation3] sm:$0xff]   ;;  %v1426_v18 = vshrl.u32 %v5773_v31, 16 }
  0xa4   : > { %4780 = vmatmul.mubr.bf16.gmra.mrb[20].mxu0 %v5920_v40  ;;  %4796 = vmatpush3.bf16.msra.mxu1 %v5408_v23  ;;  %v1410_v0 = vrot.slane %v1408_v42, 3  ;;  %v2728_v7 = vrot.slane %v1408_v42, 4 }
  0xa5   : > { %4797 = vmatprep.subr.bf16.mxu1 %v5410_v35  ;;  %4735 = vmatprep.mubr.bf16.mxu1 %v5917_v38  ;;  %v1501_v38 = vshll.u32 %v5837_v60, 16  ;;  %v1076_v1 = vsel %vm515_vm0, %v5936_v47, %v1075_v32  ;;  %v1500_v47 = vrot.slane %v1498_v61, 3  ;;  %v1078_v23 = vsel %vm515_vm0, %v1075_v32, %v1077_v9 }
  0xa6   : > { %4783 = vmatprep.mubr.bf16.mxu0 %v5943_v53  ;;  %2554 = vperm.xlu1 %5359, %v2436_v62   ;;  %v1405_v62 = vor.u32 %v1404_v36, %v1401_v22  ;;  %v2729_v9 = vrot.slane %v1411_v46, 5 }
  0xa7   : > { %2549 = vperm.xlu0 %5358, %v2435_v63   ;;  %v1503_v13 = vrot.slane %v1501_v38, 4  ;;  %v2726_v63 = vor.u32 %v2725_v41, %v2724_v44 }
  0xa8   : > { %4798 = vmatpush3.bf16.msra.mxu1 %v5410_v35 }
  0xa9   : > { %4799 = vmatprep.subr.bf16.mxu1 %v5411_v50  ;;  %v6080_v17 = vor.u32 %v1503_v13, %v1500_v47  ;;  %v5419_v13 = vld [vmem:[#allocation3 + $0x8] sm:$0xff]  }
  0xaa   : > { %2564 = vperm.xlu1 %5359, %v2438_v2   ;;  %v2444_v2 = vld [vmem:[%s6867_s3 + $0xe8] sm:$0xff] }
  0xab   : > { %4736 = vmatmul.mubr.bf16.gmra.mrb[24].mxu1 %v5920_v40  ;;  %v5414_v40 = vld [vmem:[#allocation3 + $0xf0] sm:$0xff]   ;;  %2559 = vperm.xlu0 %5358, %v2437_v11   ;;  %v6091_v32 = vsel %vm1371_vm2, %v6080_v17, %v1774_v29  ;;  %v2737_v29 = vrot.slane %v1429_v19, 5 }
  0xac   : > { %4784 = vmatmul.mubr.bf16.gmra.mrb[24].mxu0 %v5951_v55  ;;  %4800 = vmatpush3.bf16.msra.mxu1 %v5411_v50  ;;  %v1379_v55 = vor.u32 %v1378_v59, %v1375_v58  ;;  %v2442_v50 = vld [vmem:[%s6867_s3 + $0xd8] sm:$0xff]  ;;  %v1417_v58 = vshrl.u32 %v5770_v30, 16  ;;  %v1420_v59 = vshll.u32 %v5770_v30, 16  ;;  %v6108_v30 = vsel %vm2707_vm1, %v5851_v3, %v2722_v54 }
  0xad   : > { %4801 = vmatprep.subr.bf16.mxu1 %v5413_v52  ;;  %4739 = vmatprep.mubr.bf16.mxu1 %v5943_v53  ;;  %v2440_v53 = vld [vmem:[%s6867_s3 + $0xc8] sm:$0xff]  ;;  %v6118_v3 = vsel %vm2707_vm1, %v2722_v54, %v2726_v63  ;;  %v1447_v54 = vshll.u32 %v5791_v39, 16 }
  0xae   : > { %4787 = vmatprep.mubr.bf16.mxu0 %v1076_v1  ;;  %v1388_v35 = vsel %vm1371_vm2, %v1379_v55, %v6004_v14  ;;  %2574 = vperm.xlu1 %5359, %v2440_v53   ;;  %v1413_v1 = vrot.slane %v1411_v46, 4  ;;  %v1419_v11 = vrot.slane %v1417_v58, 3  ;;  %v2732_v15 = vrot.slane %v1417_v58, 4  ;;  %v5420_v55 = vld [vmem:[#allocation3 + $0x88] sm:$0xff]  }
  0xaf   : > { %2569 = vperm.xlu0 %5358, %v2439_v20   ;;  %v2730_v53 = vor.u32 %v2729_v9, %v2728_v7  ;;  %v1428_v20 = vrot.slane %v1426_v18, 3  ;;  %v1449_v7 = vrot.slane %v1447_v54, 4  ;;  %v5426_v9 = vld [vmem:[#allocation3 + $0xa0] sm:$0xff]  }
  0xb0   : > { %4802 = vmatpush3.bf16.msra.mxu1 %v5413_v52  ;;  %v1396_v52 = vor.u32 %v1395_v49, %v1392_v26  ;;  %v1414_v16 = vor.u32 %v1413_v1, %v1410_v0  ;;  %v2446_v26 = vld [vmem:[%s6867_s3 + $0xf8] sm:$0xff]  ;;  %v1438_v49 = vshll.u32 %v5785_v37, 16 }
  0xb1   : > { %4803 = vmatprep.subr.bf16.mxu1 %v5414_v40  ;;  %v3599_v0 = vld [vmem:[%s6868_s4 + $0x18] sm:$0xff] }
  0xb2   : > { %2584 = vperm.xlu1 %5359, %v2442_v50   ;;  %v6104_v4 = vsel %vm1371_vm2, %v6004_v14, %v1396_v52  ;;  %v6114_v47 = vsel %vm1371_vm2, %v1396_v52, %v1405_v62  ;;  %v2733_v14 = vrot.slane %v1420_v59, 5  ;;  %v1440_v44 = vrot.slane %v1438_v49, 4  ;;  %v5423_v50 = vld [vmem:[#allocation3 + $0x18] sm:$0xff]  }
  0xb3   : > { %4740 = vmatmul.mubr.bf16.gmra.mrb[28].mxu1 %v782_v43  ;;  %2579 = vperm.xlu0 %5358, %v2441_v57   ;;  %v1435_v43 = vshrl.u32 %v5785_v37, 16  ;;  %v3597_v37 = vld [vmem:[%s6868_s4 + $0x8] sm:$0xff]  ;;  %v2741_v46 = vrot.slane %v1438_v49, 5  ;;  %v1444_v52 = vshrl.u32 %v5791_v39, 16  ;;  %v5424_v57 = vld [vmem:[#allocation3 + $0x98] sm:$0xff]   ;;  %v1456_v39 = vshll.u32 %v5803_v45, 16 }
  0xb4   : > { %4788 = vmatmul.mubr.bf16.gmra.mrb[28].mxu0 %v1078_v23  ;;  %4804 = vmatpush3.bf16.msra.mxu1 %v5414_v40  ;;  %v1422_v40 = vrot.slane %v1420_v59, 4  ;;  %v2734_v31 = vor.u32 %v2733_v14, %v2732_v15  ;;  %v1431_v23 = vrot.slane %v1429_v19, 4  ;;  %v3596_v59 = vld [vmem:[%s6868_s4] sm:$0xff]  ;;  %v2745_v15 = vrot.slane %v1447_v54, 5  ;;  %v3598_v49 = vld [vmem:[%s6868_s4 + $0x10] sm:$0xff] }
  0xb5   : > { %4805 = vmatprep.subr.bf16.mxu1 %v5416_v33  ;;  %4807 = vmatprep.mubr.bf16.mxu1 %v1388_v35  ;;  %v6141_v35 = vsel %vm2707_vm1, %v2726_v63, %v2730_v53  ;;  %v1437_v36 = vrot.slane %v1435_v43, 3  ;;  %v2740_v42 = vrot.slane %v1435_v43, 4  ;;  %v1453_v63 = vshrl.u32 %v5803_v45, 16 }
  0xb6   : > { %4951 = vmatprep.mubr.bf16.mxu0 %v5859_v5  ;;  %v2443_v5 = vld [vmem:[%s6867_s3 + $0xe0] sm:$0xff]  ;;  %2594 = vperm.xlu1 %5359, %v2444_v2   ;;  %v1423_v8 = vor.u32 %v1422_v40, %v1419_v11  ;;  %v6147_v41 = vsel %vm2707_vm1, %v2730_v53, %v2734_v31  ;;  %v5425_v2 = vld [vmem:[#allocation3 + $0x20] sm:$0xff]   ;;  %v2744_v45 = vrot.slane %v1444_v52, 4  ;;  %v2749_v19 = vrot.slane %v1456_v39, 5 }
  0xb7   : > { %2589 = vperm.xlu0 %5358, %v2443_v5   ;;  %v2742_v1 = vor.u32 %v2741_v46, %v2740_v42  ;;  %v1446_v5 = vrot.slane %v1444_v52, 3  ;;  %v1455_v14 = vrot.slane %v1453_v63, 3  ;;  %v1465_v43 = vshll.u32 %v5808_v48, 16 }
  0xb8   : > { %4806 = vmatpush3.bf16.msra.mxu1 %v5416_v33  ;;  %v2736_v33 = vrot.slane %v1426_v18, 4  ;;  %v6144_v22 = vsel %vm1371_vm2, %v1414_v16, %v1423_v8  ;;  %v2748_v18 = vrot.slane %v1453_v63, 4 }
  0xb9   : > { %4839 = vmatprep.subr.bf16.mxu1 %v5417_v21  ;;  %v1450_v53 = vor.u32 %v1449_v7, %v1446_v5  ;;  %v2753_v46 = vrot.slane %v1465_v43, 5  ;;  %v3600_v5 = vld [vmem:[%s6868_s4 + $0x20] sm:$0xff] }
  0xba   : > { %2604 = vperm.xlu1 %5359, %v2446_v26   ;;  %v2738_v58 = vor.u32 %v2737_v29, %v2736_v33  ;;  %v5427_v26 = vld [vmem:[#allocation3 + $0x28] sm:$0xff]   ;;  %v2750_v33 = vor.u32 %v2749_v19, %v2748_v18  ;;  %v6211_v18 = vld [vmem:[#allocation3 + $0x180] sm:$0xff]  }
  0xbb   : > { %4808 = vmatmul.mubr.bf16.vlgmr.msra.gmra.mrb[32].mxu1 %v6104_v4  ;;  %2599 = vperm.xlu0 %5358, %v2445_v10   ;;  %v2746_v10 = vor.u32 %v2745_v15, %v2744_v45 }
  0xbc   : > { %4952 = vmatmul.mubr.bf16.vlgmr.msra.gmra.mrb[32].mxu0 %v6108_v30  ;;  %4840 = vmatpush3.bf16.msra.mxu1 %v5417_v21  ;;  %v1432_v21 = vor.u32 %v1431_v23, %v1428_v20  ;;  %v6167_v40 = vsel %vm2707_vm1, %v2734_v31, %v2738_v58  ;;  %v1474_v20 = vshll.u32 %v5815_v51, 16  ;;  %v3601_v23 = vld [vmem:[%s6868_s4 + $0x28] sm:$0xff] }
  0xbd   : > { %4984 = vmatpush3.bf16.msra.mxu0 %v5985_v6  ;;  %4811 = vmatprep.mubr.bf16.mxu1 %v6114_v47  ;;  %v6135_v6 = vsel %vm1371_vm2, %v1405_v62, %v1414_v16  ;;  %v1441_v62 = vor.u32 %v1440_v44, %v1437_v36  ;;  %v1458_v16 = vrot.slane %v1456_v39, 4  ;;  %v1467_v44 = vrot.slane %v1465_v43, 4 }
  0xbe   : > { %4955 = vmatprep.mubr.bf16.mxu0 %v6118_v3  ;;  %4841 = vmatprep.subr.bf16.mxu1 %v5419_v13  ;;  %v6164_v11 = vsel %vm1371_vm2, %v1423_v8, %v1432_v21  ;;  %v5428_v8 = vld [vmem:[#allocation3 + $0xa8] sm:$0xff]   ;;  %v1476_v54 = vrot.slane %v1474_v20, 4 }
  0xbf   : > { %4985 = vmatprep.subr.bf16.mxu0 %v5420_v55  ;;  %3635 = vperm.xlu1 %5359, %v3597_v37   ;;  %v1459_v31 = vor.u32 %v1458_v16, %v1455_v14  ;;  %v6190_v29 = vsel %vm1371_vm2, %v1441_v62, %v1450_v53  ;;  %v5430_v37 = vld [vmem:[#allocation3 + $0xb0] sm:$0xff]   ;;  %v3603_v14 = vld [vmem:[%s6868_s4 + $0x38] sm:$0xff] }
  0xc0   : > { %4842 = vmatpush3.bf16.msra.mxu1 %v5419_v13  ;;  %3630 = vperm.xlu0 %5358, %v3596_v59   ;;  %v6170_v13 = vsel %vm1371_vm2, %v1432_v21, %v1441_v62  ;;  %v5431_v59 = vld [vmem:[#allocation3 + $0x38] sm:$0xff]   ;;  %v5449_v62 = vld [vmem:[#allocation2 + $0x68] sm:$0xff] }
  0xc1   : > { %4986 = vmatpush3.bf16.msra.mxu0 %v5420_v55  ;;  %4843 = vmatprep.subr.bf16.mxu1 %v5421_v24  ;;  %v6173_v55 = vsel %vm2707_vm1, %v2738_v58, %v2742_v1  ;;  %v2757_v58 = vrot.slane %v1474_v20, 5  ;;  %v1480_v63 = vshrl.u32 %v5449_v62, 16  ;;  %v1483_v39 = vshll.u32 %v5449_v62, 16  ;;  %v3607_v62 = vld [vmem:[%s6868_s4 + $0x58] sm:$0xff] }
  0xc2   : > { %4987 = vmatprep.subr.bf16.mxu0 %v5422_v27 }
  0xc3   : > { %4812 = vmatmul.mubr.bf16.gmra.mrb[36].mxu1 %v6135_v6  ;;  %3645 = vperm.xlu1 %5359, %v3599_v0   ;;  %v5432_v0 = vld [vmem:[#allocation3 + $0xb8] sm:$0xff]   ;;  %v1482_v19 = vrot.slane %v1480_v63, 3  ;;  %v2760_v43 = vrot.slane %v1480_v63, 4  ;;  %v2768_v63 = vrot.slane %v1498_v61, 4 }
  0xc4   : > { %4956 = vmatmul.mubr.bf16.gmra.mrb[36].mxu0 %v6141_v35  ;;  %4815 = vmatprep.mubr.bf16.mxu1 %v6144_v22 }
  0xc5   : > { %4959 = vmatprep.mubr.bf16.mxu0 %v6147_v41  ;;  %4844 = vmatpush3.bf16.msra.mxu1 %v5421_v24  ;;  %v1462_v24 = vshrl.u32 %v5808_v48, 16  ;;  %v5429_v48 = vld [vmem:[#allocation3 + $0x30] sm:$0xff]  }
  0xc6   : > { %4988 = vmatpush3.bf16.msra.mxu0 %v5422_v27  ;;  %4845 = vmatprep.subr.bf16.mxu1 %v5423_v50  ;;  %v1471_v27 = vshrl.u32 %v5815_v51, 16  ;;  %v6193_v51 = vsel %vm2707_vm1, %v2742_v1, %v2746_v10 }
  0xc7   : > { %4989 = vmatprep.subr.bf16.mxu0 %v5424_v57  ;;  %3640 = vperm.xlu0 %5358, %v3598_v49   ;;  %v1464_v36 = vrot.slane %v1462_v24, 3  ;;  %v2752_v42 = vrot.slane %v1462_v24, 4 }
  0xc8   : > { %3655 = vperm.xlu1 %5359, %v3601_v23   ;;  %v1473_v52 = vrot.slane %v1471_v27, 3  ;;  %v2756_v21 = vrot.slane %v1471_v27, 4 }
  0xc9   : > { %4846 = vmatpush3.bf16.msra.mxu1 %v5423_v50  ;;  %v6196_v50 = vsel %vm1371_vm2, %v1450_v53, %v1459_v31  ;;  %v1468_v1 = vor.u32 %v1467_v44, %v1464_v36  ;;  %v6213_v53 = vld [vmem:[#allocation3 + $0x200] sm:$0xff]   ;;  %v3605_v36 = vld [vmem:[%s6868_s4 + $0x48] sm:$0xff]  ;;  %v5451_v44 = vld [vmem:[#allocation2 + $0x80] sm:$0xff] }
  0xca   : > { %4990 = vmatpush3.bf16.msra.mxu0 %v5424_v57  ;;  %4847 = vmatprep.subr.bf16.mxu1 %v5425_v2  ;;  %v6199_v57 = vsel %vm2707_vm1, %v2746_v10, %v2750_v33  ;;  %v1477_v7 = vor.u32 %v1476_v54, %v1473_v52  ;;  %v2758_v16 = vor.u32 %v2757_v58, %v2756_v21  ;;  %v2761_v10 = vrot.slane %v1483_v39, 5  ;;  %v3604_v58 = vld [vmem:[%s6868_s4 + $0x40] sm:$0xff] }
  0xcb   : > { %4816 = vmatmul.mubr.bf16.gmra.mrb[40].mxu1 %v6164_v11  ;;  %4991 = vmatprep.subr.bf16.mxu0 %v5426_v9 }
  0xcc   : > { %4960 = vmatmul.mubr.bf16.gmra.mrb[40].mxu0 %v6167_v40  ;;  %4819 = vmatprep.mubr.bf16.mxu1 %v6170_v13  ;;  %v6222_v49 = vsel %vm1371_vm2, %v1468_v1, %v1477_v7  ;;  %v6241_v52 = vor.u32 %v2761_v10, %v2760_v43 }
  0xcd   : > { %4963 = vmatprep.mubr.bf16.mxu0 %v6173_v55  ;;  %4848 = vmatpush3.bf16.msra.mxu1 %v5425_v2  ;;  %v2754_v2 = vor.u32 %v2753_v46, %v2752_v42  ;;  %v1507_v42 = vshrl.u32 %v5451_v44, 16  ;;  %v1510_v46 = vshll.u32 %v5451_v44, 16  ;;  %v3608_v44 = vld [vmem:[%s6868_s4 + $0x60] sm:$0xff] }
  0xce   : > { %4992 = vmatpush3.bf16.msra.mxu0 %v5426_v9  ;;  %4849 = vmatprep.subr.bf16.mxu1 %v5427_v26  ;;  %v5450_v9 = vld [vmem:[#allocation2 + $0x70] sm:$0xff] }
  0xcf   : > { %4993 = vmatprep.subr.bf16.mxu0 %v5428_v8  ;;  %v1489_v45 = vshrl.u32 %v5450_v9, 16  ;;  %v1492_v15 = vshll.u32 %v5450_v9, 16  ;;  %3650 = vperm.xlu0 %5358, %v3600_v5   ;;  %v6219_v24 = vsel %vm2707_vm1, %v2750_v33, %v2754_v2  ;;  %v6225_v23 = vsel %vm2707_vm1, %v2754_v2, %v2758_v16  ;;  %v1336_v9 = vld [vmem:[#allocation2] sm:$0xf8] }
  0xd0   : > { %3665 = vperm.xlu1 %5359, %v3603_v14   ;;  %v6263_v2 = vsel %vm2707_vm1, %v2758_v16, %v6241_v52  ;;  %v2772_v60 = vrot.slane %v1507_v42, 4 }
  0xd1   : > { %4850 = vmatpush3.bf16.msra.mxu1 %v5427_v26  ;;  %v1485_v26 = vrot.slane %v1483_v39, 4  ;;  %v1491_v27 = vrot.slane %v1489_v45, 3  ;;  %v1494_v20 = vrot.slane %v1492_v15, 4  ;;  %v2769_v39 = vrot.slane %v1501_v38, 5 }
  0xd2   : > { %4994 = vmatpush3.bf16.msra.mxu0 %v5428_v8  ;;  %4851 = vmatprep.subr.bf16.mxu1 %v5429_v48  ;;  %v6216_v8 = vsel %vm1371_vm2, %v1459_v31, %v1468_v1  ;;  %v3602_v31 = vld [vmem:[%s6868_s4 + $0x30] sm:$0xff]  ;;  %v1512_v1 = vrot.slane %v1510_v46, 4  ;;  %v2773_v38 = vrot.slane %v1510_v46, 5 }
  0xd3   : > { %4820 = vmatmul.mubr.bf16.gmra.mrb[44].mxu1 %v6190_v29  ;;  %4995 = vmatprep.subr.bf16.mxu0 %v5430_v37  ;;  %v6232_v33 = vor.u32 %v1485_v26, %v1482_v19  ;;  %v6243_v54 = vor.u32 %v1494_v20, %v1491_v27  ;;  %v6284_v14 = vor.u32 %v2769_v39, %v2768_v63  ;;  %v1516_v19 = vshrl.u32 %v5953_v56, 16 }
  0xd4   : > { %4964 = vmatmul.mubr.bf16.gmra.mrb[44].mxu0 %v6193_v51  ;;  %4823 = vmatprep.mubr.bf16.mxu1 %v6196_v50  ;;  %v1519_v26 = vshll.u32 %v5953_v56, 16  ;;  %v1750_v27 = vshrl.u32 %v1336_v9, 16  ;;  %v1753_v20 = vshll.u32 %v1336_v9, 16 }
  0xd5   : > { %4967 = vmatprep.mubr.bf16.mxu0 %v6199_v57  ;;  %4852 = vmatpush3.bf16.msra.mxu1 %v5429_v48  ;;  %v2764_v48 = vrot.slane %v1489_v45, 4  ;;  %v6268_v5 = vsel %vm1371_vm2, %v6232_v33, %v6243_v54  ;;  %v3606_v45 = vld [vmem:[%s6868_s4 + $0x50] sm:$0xff]  ;;  %v6299_v56 = vsel %vm1371_vm2, %v6243_v54, %v6080_v17 }
  0xd6   : > { %4996 = vmatpush3.bf16.msra.mxu0 %v5430_v37  ;;  %4853 = vmatprep.subr.bf16.mxu1 %v5431_v59  ;;  %v2765_v37 = vrot.slane %v1492_v15, 5  ;;  %v3609_v15 = vld [vmem:[%s6868_s4 + $0x68] sm:$0xff]  ;;  %v1521_v63 = vrot.slane %v1519_v26, 4 }
  0xd7   : > { %4997 = vmatprep.subr.bf16.mxu0 %v5432_v0  ;;  %3660 = vperm.xlu0 %5358, %v3602_v31  }
  0xd8   : > { %v6245_v21 = vor.u32 %v2765_v37, %v2764_v48  ;;  %3675 = vperm.xlu1 %5359, %v3605_v36   ;;  %v6291_v48 = vor.u32 %v2773_v38, %v2772_v60  ;;  %v5452_v37 = vld [vmem:[#allocation2] sm:$0xf0] }
  0xd9   : > { %4854 = vmatpush3.bf16.msra.mxu1 %v5431_v59  ;;  %v6252_v59 = vsel %vm1371_vm2, %v1477_v7, %v6232_v33  ;;  %v2689_v7 = vld [vmem:[#allocation2 + $0x88] sm:$0x1f]  ;;  %v3011_v31 = vshrl.u32 %v5452_v37, 16  ;;  %v3014_v36 = vshll.u32 %v5452_v37, 16 }
  0xda   : > { %4998 = vmatpush3.bf16.msra.mxu0 %v5432_v0  ;;  %4887 = vmatprep.subr.bf16.mxu1 %v6211_v18  ;;  %v1509_v0 = vrot.slane %v1507_v42, 3  ;;  %v6273_v61 = vsel %vm2707_vm1, %v6241_v52, %v6245_v21  ;;  %v2777_v43 = vshrl.u32 %v2689_v7, 16  ;;  %v2780_v10 = vshll.u32 %v2689_v7, 16  ;;  %v3611_v42 = vld [vmem:[%s6868_s4 + $0x78] sm:$0xff] }
  0xdb   : > { %4824 = vmatmul.mubr.bf16.gmra.mrb[48].mxu1 %v6216_v8  ;;  %5031 = vmatprep.subr.bf16.mxu0 %v6213_v53  ;;  %v6307_v46 = vsel %vm2707_vm1, %v6245_v21, %v6284_v14  ;;  %v1755_v7 = vrot.slane %v1753_v20, 4  ;;  %v2775_v60 = vsel %vm2707_vm1, %v6284_v14, %v6291_v48  ;;  %v3013_v38 = vrot.slane %v3011_v31, 4 }
  0xdc   : > { %4968 = vmatmul.mubr.bf16.gmra.mrb[48].mxu0 %v6219_v24  ;;  %4827 = vmatprep.mubr.bf16.mxu1 %v6222_v49  ;;  %v6286_v16 = vor.u32 %v1512_v1, %v1509_v0  ;;  %v2779_v39 = vrot.slane %v2777_v43, 4  ;;  %v2782_v0 = vrot.slane %v2780_v10, 5  ;;  %v1752_v1 = vrot.slane %v1750_v27, 3  ;;  %v3612_v10 = vld [vmem:[%s6868_s4 + $0x80] sm:$0xff]  ;;  %v3615_v27 = vld [vmem:[%s6868_s4 + $0x98] sm:$0xff] }
  0xdd   : > { %4971 = vmatprep.mubr.bf16.mxu0 %v6225_v23  ;;  %3670 = vperm.xlu0 %5358, %v3604_v58   ;;  %v3016_v9 = vrot.slane %v3014_v36, 5 }
  0xde   : > { %3685 = vperm.xlu1 %5359, %v3607_v62   ;;  %v1514_v58 = vsel %vm1371_vm2, %v6080_v17, %v6286_v16  ;;  %v1518_v62 = vrot.slane %v1516_v19, 3  ;;  %v3613_v17 = vld [vmem:[%s6868_s4 + $0x88] sm:$0xff]  ;;  %v2783_v19 = vor.u32 %v2782_v0, %v2779_v39  ;;  %v1756_v26 = vor.u32 %v1755_v7, %v1752_v1  ;;  %v5442_v1 = vld [vmem:[#allocation3 + $0x220] sm:$0xff]   ;;  %v3624_v7 = vld [vmem:[%s6868_s4 + $0xe0] sm:$0xff] }
  0xdf   : > { %v3017_v43 = vor.u32 %v3016_v9, %v3013_v38  ;;  %v5437_v39 = vld [vmem:[#allocation3 + $0x190] sm:$0xff]   ;;  %v3626_v38 = vld [vmem:[%s6868_s4 + $0xf0] sm:$0xff] }
  0xe0   : > { %v2784_v37 = vsel %vm2707_vm1, %v6291_v48, %v2783_v19  ;;  %v1765_v31 = vsel %vm1371_vm2, %v1756_v26, %v6009_v25  ;;  %v3616_v25 = vld [vmem:[%s6868_s4 + $0xa0] sm:$0xff]  ;;  %v3621_v0 = vld [vmem:[%s6868_s4 + $0xc8] sm:$0xff] }
  0xe1   : > { %3680 = vperm.xlu0 %5358, %v3606_v45   ;;  %v3610_v45 = vld [vmem:[%s6868_s4 + $0x70] sm:$0xff]  ;;  %v3021_v36 = vsel %vm2707_vm1, %v3017_v43, %v6013_v28  ;;  %v3619_v28 = vld [vmem:[%s6868_s4 + $0xb8] sm:$0xff] }
  0xe2   : > { %3695 = vperm.xlu1 %5359, %v3609_v15   ;;  %v1522_v15 = vor.u32 %v1521_v63, %v1518_v62  ;;  %v5436_v62 = vld [vmem:[#allocation3 + $0x208] sm:$0xff]   ;;  %v3618_v63 = vld [vmem:[%s6868_s4 + $0xb0] sm:$0xff] }
  0xe3   : > { %4828 = vmatmul.mubr.bf16.gmra.mrb[52].mxu1 %v6252_v59 }
  0xe4   : > { %4972 = vmatmul.mubr.bf16.gmra.mrb[52].mxu0 %v6263_v2  ;;  %4831 = vmatprep.mubr.bf16.mxu1 %v6268_v5  ;;  %v1523_v20 = vsel %vm1371_vm2, %v6286_v16, %v1522_v15 }
  0xe5   : > { %4975 = vmatprep.mubr.bf16.mxu0 %v6273_v61  ;;  %3690 = vperm.xlu0 %5358, %v3608_v44   ;;  %v3614_v44 = vld [vmem:[%s6868_s4 + $0x90] sm:$0xff] }
  0xe6   : > { %3705 = vperm.xlu1 %5359, %v3611_v42   ;;  %v3617_v42 = vld [vmem:[%s6868_s4 + $0xa8] sm:$0xff] }
  0xe9   : > { %3700 = vperm.xlu0 %5358, %v3610_v45   ;;  %v5453_v45 = vld [vmem:[#allocation2 + $0x18] sm:$0xff] }
  0xea   : > { %3715 = vperm.xlu1 %5359, %v3613_v17   ;;  %v2018_v17 = vshll.u32 %v5453_v45, 16 }
  0xeb   : > { %4832 = vmatmul.mubr.bf16.gmra.mrb[56].mxu1 %v6299_v56 }
  0xec   : > { %4976 = vmatmul.mubr.bf16.gmra.mrb[56].mxu0 %v6307_v46  ;;  %4835 = vmatprep.mubr.bf16.mxu1 %v1514_v58  ;;  %v5435_v58 = vld [vmem:[#allocation3 + $0x188] sm:$0xff]  }
  0xed   : > { %4979 = vmatprep.mubr.bf16.mxu0 %v2775_v60  ;;  %3710 = vperm.xlu0 %5358, %v3612_v10   ;;  %v5446_v60 = vld [vmem:[#allocation3 + $0x230] sm:$0xff]  }
  0xee   : > { %3725 = vperm.xlu1 %5359, %v3615_v27  }
  0xf1   : > { %3720 = vperm.xlu0 %5358, %v3614_v44  }
  0xf2   : > { %3735 = vperm.xlu1 %5359, %v3617_v42  }
  0xf3   : > { %4836 = vmatmul.mubr.bf16.gmra.mrb[60].mxu1 %v1523_v20 }
  0xf4   : > { %4980 = vmatmul.mubr.bf16.gmra.mrb[60].mxu0 %v2784_v37  ;;  %4855 = vmatprep.mubr.bf16.mxu1 %v1765_v31  ;;  %v3271_v37 = vrot.slane %v2018_v17, 5  ;;  %v5455_v31 = vld [vmem:[#allocation2 + $0x20] sm:$0xff] }
  0xf5   : > { %4999 = vmatprep.mubr.bf16.mxu0 %v3021_v36  ;;  %3730 = vperm.xlu0 %5358, %v3616_v25   ;;  %v2024_v36 = vshrl.u32 %v5455_v31, 16  ;;  %v2027_v44 = vshll.u32 %v5455_v31, 16 }
  0xf6   : > { %3745 = vperm.xlu1 %5359, %v3619_v28   ;;  %v5456_v28 = vld [vmem:[#allocation2 + $0x28] sm:$0xff] }
  0xf9   : > { %3740 = vperm.xlu0 %5358, %v3618_v63  }
  0xfa   : > { %3755 = vperm.xlu1 %5359, %v3621_v0  }
  0xfb   : > { %4856 = vmatmul.mubr.bf16.vlgmr.msra.gmra.mrb[32].mxu1 %v6018_v12  ;;  %v5438_v12 = vld [vmem:[#allocation3 + $0x210] sm:$0xff]  }
  0xfc   : > { %5000 = vmatmul.mubr.bf16.vlgmr.msra.gmra.mrb[32].mxu0 %v6029_v34  ;;  %4888 = vmatpush3.bf16.msra.mxu1 %v6211_v18  ;;  %v3620_v34 = vld [vmem:[%s6868_s4 + $0xc0] sm:$0xff]  ;;  %v5440_v18 = vld [vmem:[#allocation3 + $0x218] sm:$0xff]  }
  0xfd   : > { %5032 = vmatpush3.bf16.msra.mxu0 %v6213_v53  ;;  %4859 = vmatprep.mubr.bf16.mxu1 %v6104_v4  ;;  %v5439_v4 = vld [vmem:[#allocation3 + $0x198] sm:$0xff]  }
  0xfe   : > { %5003 = vmatprep.mubr.bf16.mxu0 %v6108_v30  ;;  %4889 = vmatprep.subr.bf16.mxu1 %v5435_v58  ;;  %v3623_v30 = vld [vmem:[%s6868_s4 + $0xd8] sm:$0xff]  ;;  %v3622_v53 = vld [vmem:[%s6868_s4 + $0xd0] sm:$0xff] }
  0xff   : > { %5033 = vmatprep.subr.bf16.mxu0 %v5436_v62  ;;  %3750 = vperm.xlu0 %5358, %v3620_v34  }
 0x100   : > { %4890 = vmatpush3.bf16.msra.mxu1 %v5435_v58  ;;  %3765 = vperm.xlu1 %5359, %v3623_v30   ;;  %v2033_v58 = vshrl.u32 %v5456_v28, 16  ;;  %v3274_v30 = vrot.slane %v2024_v36, 4 }
 0x101   : > { %5034 = vmatpush3.bf16.msra.mxu0 %v5436_v62  ;;  %4891 = vmatprep.subr.bf16.mxu1 %v5437_v39  ;;  %v2036_v62 = vshll.u32 %v5456_v28, 16 }
 0x102   : > { %5035 = vmatprep.subr.bf16.mxu0 %v5438_v12 }
 0x103   : > { %4860 = vmatmul.mubr.bf16.gmra.mrb[36].mxu1 %v6114_v47  ;;  %v5441_v47 = vld [vmem:[#allocation3 + $0x1a0] sm:$0xff]   ;;  %3760 = vperm.xlu0 %5358, %v3622_v53  }
 0x104   : > { %5004 = vmatmul.mubr.bf16.gmra.mrb[36].mxu0 %v6118_v3  ;;  %4863 = vmatprep.mubr.bf16.mxu1 %v6135_v6  ;;  %v5443_v3 = vld [vmem:[#allocation3 + $0x1a8] sm:$0xff]  }
 0x105   : > { %5007 = vmatprep.mubr.bf16.mxu0 %v6141_v35  ;;  %4892 = vmatpush3.bf16.msra.mxu1 %v5437_v39  ;;  %v5444_v6 = vld [vmem:[#allocation3 + $0x228] sm:$0xff]   ;;  %v3625_v35 = vld [vmem:[%s6868_s4 + $0xe8] sm:$0xff] }
 0x106   : > { %5036 = vmatpush3.bf16.msra.mxu0 %v5438_v12  ;;  %4893 = vmatprep.subr.bf16.mxu1 %v5439_v4 }
 0x107   : > { %5037 = vmatprep.subr.bf16.mxu0 %v5440_v18  ;;  %3775 = vperm.xlu1 %5359, %v3625_v35   ;;  %v3278_v35 = vrot.slane %v2033_v58, 4 }
 0x108   : > { %3770 = vperm.xlu0 %5358, %v3624_v7   ;;  %v3279_v7 = vrot.slane %v2036_v62, 5 }
 0x109   : > { %4894 = vmatpush3.bf16.msra.mxu1 %v5439_v4  ;;  %v2026_v4 = vrot.slane %v2024_v36, 3  ;;  %v5460_v36 = vld [vmem:[#allocation2 + $0x48] sm:$0xff] }
 0x10a   : > { %5038 = vmatpush3.bf16.msra.mxu0 %v5440_v18  ;;  %4895 = vmatprep.subr.bf16.mxu1 %v5441_v47  ;;  %v2029_v18 = vrot.slane %v2027_v44, 4 }
 0x10b   : > { %4864 = vmatmul.mubr.bf16.gmra.mrb[40].mxu1 %v6144_v22  ;;  %5039 = vmatprep.subr.bf16.mxu0 %v5442_v1  ;;  %v5445_v22 = vld [vmem:[#allocation3 + $0x1b0] sm:$0xff]  }
 0x10c   : > { %5008 = vmatmul.mubr.bf16.gmra.mrb[40].mxu0 %v6147_v41  ;;  %4867 = vmatprep.mubr.bf16.mxu1 %v6164_v11  ;;  %v5447_v41 = vld [vmem:[#allocation3 + $0x1b8] sm:$0xff]  }
 0x10d   : > { %5011 = vmatprep.mubr.bf16.mxu0 %v6167_v40  ;;  %4896 = vmatpush3.bf16.msra.mxu1 %v5441_v47  ;;  %v5448_v11 = vld [vmem:[#allocation3 + $0x238] sm:$0xff]   ;;  %v3627_v40 = vld [vmem:[%s6868_s4 + $0xf8] sm:$0xff]  ;;  %v3275_v47 = vrot.slane %v2027_v44, 5  ;;  %v2069_v44 = vshrl.u32 %v5460_v36, 16 }
 0x10e   : > { %5040 = vmatpush3.bf16.msra.mxu0 %v5442_v1  ;;  %4897 = vmatprep.subr.bf16.mxu1 %v5443_v3  ;;  %v2035_v1 = vrot.slane %v2033_v58, 3 }
 0x10f   : > { %5041 = vmatprep.subr.bf16.mxu0 %v5444_v6  ;;  %3785 = vperm.xlu1 %5359, %v3627_v40  }
 0x110   : > { %3780 = vperm.xlu0 %5358, %v3626_v38   ;;  %v5458_v38 = vld [vmem:[#allocation2 + $0x38] sm:$0xff] }
 0x111   : > { %4898 = vmatpush3.bf16.msra.mxu1 %v5443_v3  ;;  %v2038_v3 = vrot.slane %v2036_v62, 4 }
 0x112   : > { %5042 = vmatpush3.bf16.msra.mxu0 %v5444_v6  ;;  %4899 = vmatprep.subr.bf16.mxu1 %v5445_v22 }
 0x113   : > { %4868 = vmatmul.mubr.bf16.gmra.mrb[44].mxu1 %v6170_v13  ;;  %5043 = vmatprep.subr.bf16.mxu0 %v5446_v60  ;;  %v2671_v13 = vld [vmem:[#allocation2 + $0x80] sm:$0x1f]  ;;  %v2039_v40 = vor.u32 %v2038_v3, %v2035_v1  ;;  %v2071_v1 = vrot.slane %v2069_v44, 3 }
 0x114   : > { %5012 = vmatmul.mubr.bf16.gmra.mrb[44].mxu0 %v6173_v55  ;;  %4871 = vmatprep.mubr.bf16.mxu1 %v6190_v29  ;;  %v1988_v55 = vld [vmem:[#allocation2 + $0x10] sm:$0xf8]  ;;  %v3024_v29 = vshrl.u32 %v2671_v13, 16 }
 0x115   : > { %5015 = vmatprep.mubr.bf16.mxu0 %v6193_v51  ;;  %4900 = vmatpush3.bf16.msra.mxu1 %v5445_v22  ;;  %v3027_v51 = vshll.u32 %v2671_v13, 16  ;;  %v2007_v9 = vshrl.u32 %v1988_v55, 16  ;;  %v5457_v22 = vld [vmem:[#allocation2 + $0x30] sm:$0xff]  ;;  %v2051_v13 = vshrl.u32 %v5458_v38, 16 }
 0x116   : > { %5044 = vmatpush3.bf16.msra.mxu0 %v5446_v60  ;;  %4901 = vmatprep.subr.bf16.mxu1 %v5447_v41  ;;  %v3026_v19 = vrot.slane %v3024_v29, 4  ;;  %v2042_v60 = vshrl.u32 %v5457_v22, 16 }
 0x117   : > { %5045 = vmatprep.subr.bf16.mxu0 %v5448_v11  ;;  %v3029_v26 = vrot.slane %v3027_v51, 5  ;;  %v2009_v43 = vrot.slane %v2007_v9, 3  ;;  %v3280_v51 = vor.u32 %v3279_v7, %v3278_v35  ;;  %v3294_v35 = vrot.slane %v2069_v44, 4  ;;  %v5463_v44 = vld [vmem:[#allocation2 + $0x60] sm:$0xff] }
 0x119   : > { %4902 = vmatpush3.bf16.msra.mxu1 %v5447_v41  ;;  %v2045_v41 = vshll.u32 %v5457_v22, 16  ;;  %v5461_v22 = vld [vmem:[#allocation2 + $0x50] sm:$0xff] }
 0x11a   : > { %5046 = vmatpush3.bf16.msra.mxu0 %v5448_v11  ;;  %v3276_v11 = vor.u32 %v3275_v47, %v3274_v30 }
 0x11b   : > { %4872 = vmatmul.mubr.bf16.gmra.mrb[48].mxu1 %v6196_v50  ;;  %v2010_v50 = vshll.u32 %v1988_v55, 16  ;;  %v2054_v55 = vshll.u32 %v5458_v38, 16  ;;  %v5462_v38 = vld [vmem:[#allocation2 + $0x58] sm:$0xff] }
 0x11c   : > { %5016 = vmatmul.mubr.bf16.gmra.mrb[48].mxu0 %v6199_v57  ;;  %4875 = vmatprep.mubr.bf16.mxu1 %v6216_v8  ;;  %v2015_v57 = vshrl.u32 %v5453_v45, 16  ;;  %v5454_v8 = vld [vmem:[#allocation2 + $0x10] sm:$0xf0]  ;;  %v2047_v45 = vrot.slane %v2045_v41, 4 }
 0x11d   : > { %5019 = vmatprep.mubr.bf16.mxu0 %v6219_v24  ;;  %v3263_v15 = vshrl.u32 %v5454_v8, 16  ;;  %v3266_v24 = vshll.u32 %v5454_v8, 16  ;;  %v3283_v8 = vrot.slane %v2045_v41, 5  ;;  %v2081_v41 = vshll.u32 %v5461_v22, 16 }
 0x11e   : > { %v2017_v10 = vrot.slane %v2015_v57, 3  ;;  %v3270_v20 = vrot.slane %v2015_v57, 4 }
 0x11f   : > { %v3265_v27 = vrot.slane %v3263_v15, 4 }
 0x120   : > { %v3272_v0 = vor.u32 %v3271_v37, %v3270_v20  ;;  %v5459_v20 = vld [vmem:[#allocation2 + $0x40] sm:$0xff] }
 0x121   : > { %v2060_v37 = vshrl.u32 %v5459_v20, 16 }
 0x123   : > { %4876 = vmatmul.mubr.bf16.gmra.mrb[52].mxu1 %v6222_v49  ;;  %v2012_v49 = vrot.slane %v2010_v50, 4  ;;  %v2044_v50 = vrot.slane %v2042_v60, 3 }
 0x124   : > { %5020 = vmatmul.mubr.bf16.gmra.mrb[52].mxu0 %v6225_v23  ;;  %4879 = vmatprep.mubr.bf16.mxu1 %v6252_v59  ;;  %v2020_v23 = vrot.slane %v2018_v17, 4  ;;  %v3268_v59 = vrot.slane %v3266_v24, 5  ;;  %v3282_v17 = vrot.slane %v2042_v60, 4  ;;  %v3277_v24 = vsel %vm2707_vm1, %v3272_v0, %v3276_v11 }
 0x125   : > { %5023 = vmatprep.mubr.bf16.mxu0 %v6263_v2  ;;  %v3030_v2 = vor.u32 %v3029_v26, %v3026_v19  ;;  %v2013_v42 = vor.u32 %v2012_v49, %v2009_v43  ;;  %v2053_v26 = vrot.slane %v2051_v13, 3  ;;  %v2056_v43 = vrot.slane %v2054_v55, 4 }
 0x126   : > { %v2021_v25 = vor.u32 %v2020_v23, %v2017_v10  ;;  %v3269_v39 = vor.u32 %v3268_v59, %v3265_v27  ;;  %v3281_v49 = vsel %vm2707_vm1, %v3276_v11, %v3280_v51  ;;  %v3286_v10 = vrot.slane %v2051_v13, 4 }
 0x127   : > { %v3287_v23 = vrot.slane %v2054_v55, 5  ;;  %v2048_v27 = vor.u32 %v2047_v45, %v2044_v50  ;;  %v3284_v59 = vor.u32 %v3283_v8, %v3282_v17  ;;  %v2057_v31 = vor.u32 %v2056_v43, %v2053_v26 }
 0x128   : > { %v2022_v53 = vsel %vm1371_vm2, %v2013_v42, %v2021_v25  ;;  %v3273_v6 = vsel %vm2707_vm1, %v3269_v39, %v3272_v0  ;;  %v2072_v42 = vshll.u32 %v5460_v36, 16  ;;  %v2078_v60 = vshrl.u32 %v5461_v22, 16 }
 0x129   : > { %v3288_v28 = vor.u32 %v3287_v23, %v3286_v10  ;;  %v2049_v62 = vsel %vm1371_vm2, %v2039_v40, %v2048_v27  ;;  %v3285_v0 = vsel %vm2707_vm1, %v3280_v51, %v3284_v59  ;;  %v2087_v13 = vshrl.u32 %v5462_v38, 16 }
 0x12a   : > { %v2074_v3 = vrot.slane %v2072_v42, 4  ;;  %v3295_v7 = vrot.slane %v2072_v42, 5  ;;  %v2090_v55 = vshll.u32 %v5462_v38, 16  ;;  %v2083_v17 = vrot.slane %v2081_v41, 4 }
 0x12b   : > { %4880 = vmatmul.mubr.bf16.gmra.mrb[56].mxu1 %v6268_v5  ;;  %v3298_v8 = vrot.slane %v2078_v60, 4  ;;  %v2089_v23 = vrot.slane %v2087_v13, 3  ;;  %v2096_v42 = vshrl.u32 %v5463_v44, 16 }
 0x12c   : > { %5024 = vmatmul.mubr.bf16.gmra.mrb[56].mxu0 %v6273_v61  ;;  %4883 = vmatprep.mubr.bf16.mxu1 %v6299_v56  ;;  %v3031_v56 = vsel %vm2707_vm1, %v6284_v14, %v3030_v2  ;;  %v2030_v14 = vor.u32 %v2029_v18, %v2026_v4  ;;  %v2063_v2 = vshll.u32 %v5459_v20, 16  ;;  %v3290_v18 = vrot.slane %v2060_v37, 4 }
 0x12d   : > { %5027 = vmatprep.mubr.bf16.mxu0 %v6307_v46  ;;  %v3296_v50 = vor.u32 %v3295_v7, %v3294_v35  ;;  %v3302_v20 = vrot.slane %v2087_v13, 4 }
 0x12e   : > { %v6406_v63 = vpop.f32.mrb[0].mxu1  ;;  %v2031_v57 = vsel %vm1371_vm2, %v2021_v25, %v2030_v14  ;;  %v2040_v19 = vsel %vm1371_vm2, %v2030_v14, %v2039_v40  ;;  %v2065_v4 = vrot.slane %v2063_v2, 4  ;;  %v3291_v47 = vrot.slane %v2063_v2, 5 }
 0x12f   : > { %v6408_v12 = vpop.f32.mrb[1].mxu1  ;;  %v2075_v40 = vor.u32 %v2074_v3, %v2071_v1  ;;  %v3306_v3 = vrot.slane %v2096_v42, 4 }
 0x130   : > { %v6410_v34 = vpop.f32.mrb[2].mxu1  ;;  %v3292_v11 = vor.u32 %v3291_v47, %v3290_v18  ;;  %v2098_v18 = vrot.slane %v2096_v42, 3 }
 0x131   : > { %v6414_v46 = vpop.f32.mrb[3].mxu1 }
 0x133   : > { %4884 = vmatmul.mubr.bf16.gmra.mrb[60].mxu1 %v6091_v32 }
 0x134   : > { %5028 = vmatmul.mubr.bf16.gmra.mrb[60].mxu0 %v3031_v56  ;;  %4903 = vmatprep.mubr.bf16.mxu1 %v2022_v53  ;;  %v2062_v56 = vrot.slane %v2060_v37, 3  ;;  %v2058_v53 = vsel %vm1371_vm2, %v2048_v27, %v2057_v31  ;;  %v2092_v27 = vrot.slane %v2090_v55, 4  ;;  %v3303_v37 = vrot.slane %v2090_v55, 5 }
 0x135   : > { %5047 = vmatprep.mubr.bf16.mxu0 %v3273_v6  ;;  %v3289_v6 = vsel %vm2707_vm1, %v3284_v59, %v3288_v28  ;;  %v3297_v59 = vsel %vm2707_vm1, %v3292_v11, %v3296_v50 }
 0x136   : > { %v6419_v29 = vpop.f32.mrb[4].mxu1  ;;  %v2066_v14 = vor.u32 %v2065_v4, %v2062_v56 }
 0x137   : > { %v6421_v9 = vpop.f32.mrb[5].mxu1 }
 0x138   : > { %v6423_v32 = vpop.f32.mrb[6].mxu1  ;;  %v2067_v26 = vsel %vm1371_vm2, %v2057_v31, %v2066_v14  ;;  %v2076_v10 = vsel %vm1371_vm2, %v2066_v14, %v2075_v40  ;;  %v2099_v31 = vshll.u32 %v5463_v44, 16 }
 0x139   : > { %v6426_v15 = vpop.f32.mrb[7].mxu1 }
 0x13a   : > { %v2101_v1 = vrot.slane %v2099_v31, 4 }
 0x13b   : > { %4904 = vmatmul.mubr.bf16.vlgmr.msra.gmra.mrb[32].mxu1 %v2031_v57  ;;  %v2080_v57 = vrot.slane %v2078_v60, 3 }
 0x13c   : > { %5048 = vmatmul.mubr.bf16.vlgmr.msra.gmra.mrb[32].mxu0 %v3277_v24  ;;  %4907 = vmatprep.mubr.bf16.mxu1 %v2040_v19  ;;  %v3299_v24 = vrot.slane %v2081_v41, 5 }
 0x13d   : > { %5051 = vmatprep.mubr.bf16.mxu0 %v3281_v49  ;;  %v3293_v49 = vsel %vm2707_vm1, %v3288_v28, %v3292_v11  ;;  %v2084_v2 = vor.u32 %v2083_v17, %v2080_v57 }
 0x13e   : > { %v6431_v25 = vpop.f32.mrb[8].mxu1  ;;  %v3300_v36 = vor.u32 %v3299_v24, %v3298_v8 }
 0x13f   : > { %v6433_v58 = vpop.f32.mrb[9].mxu1  ;;  %v2085_v56 = vsel %vm1371_vm2, %v2075_v40, %v2084_v2 }
 0x140   : > { %v6436_v39 = vpop.f32.mrb[10].mxu1  ;;  %v3301_v4 = vsel %vm2707_vm1, %v3296_v50, %v3300_v36 }
 0x141   : > { %v6439_v30 = vpop.f32.mrb[11].mxu1 }
 0x143   : > { %4908 = vmatmul.mubr.bf16.gmra.mrb[36].mxu1 %v2049_v62  ;;  %v2093_v62 = vor.u32 %v2092_v27, %v2089_v23 }
 0x144   : > { %5052 = vmatmul.mubr.bf16.gmra.mrb[36].mxu0 %v3285_v0  ;;  %4911 = vmatprep.mubr.bf16.mxu1 %v2058_v53  ;;  %v3304_v0 = vor.u32 %v3303_v37, %v3302_v20 }
 0x145   : > { %5055 = vmatprep.mubr.bf16.mxu0 %v3289_v6  ;;  %v3307_v6 = vrot.slane %v2099_v31, 5  ;;  %v2094_v22 = vsel %vm1371_vm2, %v2084_v2, %v2093_v62 }
 0x146   : > { %v6443_v51 = vpop.f32.mrb[12].mxu1  ;;  %v3305_v14 = vsel %vm2707_vm1, %v3300_v36, %v3304_v0 }
 0x147   : > { %v6445_v45 = vpop.f32.mrb[13].mxu1  ;;  %v3308_v40 = vor.u32 %v3307_v6, %v3306_v3 }
 0x148   : > { %v6447_v19 = vpop.f32.mrb[14].mxu1 }
 0x149   : > { %v6450_v43 = vpop.f32.mrb[15].mxu1  ;;  %v3309_v17 = vsel %vm2707_vm1, %v3304_v0, %v3308_v40 }
 0x14b   : > { %4912 = vmatmul.mubr.bf16.gmra.mrb[40].mxu1 %v2067_v26 }
 0x14c   : > { %5056 = vmatmul.mubr.bf16.gmra.mrb[40].mxu0 %v3293_v49  ;;  %4915 = vmatprep.mubr.bf16.mxu1 %v2076_v10 }
 0x14d   : > { %5059 = vmatprep.mubr.bf16.mxu0 %v3297_v59 }
 0x14f   : > { %v4761_v28 = vpop.f32.mrb[0].mxu0 }
 0x150   : > { %v6458_v53 = vadd.f32 %v4761_v28, %v6406_v63  ;;  %v1177_v47 = vpop.f32.mrb[1].mxu0  ;;  %v2102_v63 = vor.u32 %v2101_v1, %v2098_v18 }
 0x151   : > { %v6461_v35 = vadd.f32 %v1177_v47, %v6408_v12  ;;  %v4762_v7 = vpop.f32.mrb[2].mxu0  ;;  %v5464_v12 = vld [vmem:[#allocation2 + $0x78] sm:$0xff]  ;;  %v3244_v47 = vld [vmem:[#allocation2 + $0x90] sm:$0x1f] }
 0x152   : > { %v6465_v60 = vadd.f32 %v4762_v7, %v6410_v34  ;;  %v1180_v41 = vpop.f32.mrb[3].mxu0  ;;  %v2123_v38 = vshrl.u32 %v5464_v12, 16  ;;  %v2126_v13 = vshll.u32 %v5464_v12, 16  ;;  %v2103_v57 = vsel %vm1371_vm2, %v2093_v62, %v2102_v63 }
 0x153   : > { %v6469_v11 = vadd.f32 %v1180_v41, %v6414_v46  ;;  %4916 = vmatmul.mubr.bf16.gmra.mrb[44].mxu1 %v2085_v56  ;;  %v2112_v24 = vsel %vm1371_vm2, %v2102_v63, %v6232_v33  ;;  %v5465_v33 = vld [vmem:[#allocation2 + $0x88] sm:$0xff]  ;;  %v3331_v6 = vshrl.u32 %v3244_v47, 16  ;;  %v3334_v7 = vshll.u32 %v3244_v47, 16  ;;  %v6545_v47 = vpop.permute.xlu1 %2459 }
 0x154   : > { %5060 = vmatmul.mubr.bf16.gmra.mrb[44].mxu0 %v3301_v4  ;;  %4919 = vmatprep.mubr.bf16.mxu1 %v2094_v22  ;;  %v2125_v26 = vrot.slane %v2123_v38, 3  ;;  %v2128_v49 = vrot.slane %v2126_v13, 4  ;;  %v3318_v27 = vrot.slane %v2123_v38, 4  ;;  %v3319_v59 = vrot.slane %v2126_v13, 5 }
 0x155   : > { %5063 = vmatprep.mubr.bf16.mxu0 %v3305_v14  ;;  %v2141_v37 = vshrl.u32 %v5465_v33, 16  ;;  %v2144_v2 = vshll.u32 %v5465_v33, 16  ;;  %v3333_v13 = vrot.slane %v3331_v6, 4 }
 0x156   : > { %v3320_v36 = vor.u32 %v3319_v59, %v3318_v27 }
 0x157   : > { %v4765_v55 = vpop.f32.mrb[4].mxu0  ;;  %v2143_v62 = vrot.slane %v2141_v37, 3  ;;  %v2146_v0 = vrot.slane %v2144_v2, 4  ;;  %v3326_v18 = vrot.slane %v2141_v37, 4 }
 0x158   : > { %v6472_v50 = vadd.f32 %v4765_v55, %v6419_v29  ;;  %v1193_v34 = vpop.f32.mrb[5].mxu0  ;;  %v3313_v29 = vsel %vm2707_vm1, %v3308_v40, %v6241_v52  ;;  %v3321_v4 = vsel %vm2707_vm1, %v6245_v21, %v3320_v36  ;;  %v3336_v55 = vrot.slane %v3334_v7, 5 }
 0x159   : > { %v6477_v46 = vadd.f32 %v1193_v34, %v6421_v9  ;;  %v4766_v8 = vpop.f32.mrb[6].mxu0  ;;  %v2129_v9 = vor.u32 %v2128_v49, %v2125_v26 }
 0x15a   : > { %v6482_v10 = vadd.f32 %v4766_v8, %v6423_v32  ;;  %v1196_v23 = vpop.f32.mrb[7].mxu0  ;;  %v3337_v8 = vor.u32 %v3336_v55, %v3333_v13 }
 0x15b   : > { %v6487_v20 = vadd.f32 %v1196_v23, %v6426_v15  ;;  %4920 = vmatmul.mubr.bf16.gmra.mrb[48].mxu1 %v2103_v57  ;;  %v2130_v15 = vsel %vm1371_vm2, %v6243_v54, %v2129_v9  ;;  %v5466_v54 = vld [vmem:[#allocation2 + $0x90] sm:$0xf]  ;;  %v2139_v41 = vsel %vm1371_vm2, %v2129_v9, %v6286_v16 }
 0x15c   : > { %5064 = vmatmul.mubr.bf16.gmra.mrb[48].mxu0 %v3309_v17  ;;  %4923 = vmatprep.mubr.bf16.mxu1 %v2112_v24  ;;  %v2153_v3 = vshll.u32 %v5466_v54, 16 }
 0x15d   : > { %5067 = vmatprep.mubr.bf16.mxu0 %v3313_v29 }
 0x15e   : > { %v2155_v63 = vrot.slane %v2153_v3, 4 }
 0x15f   : > { %v4769_v32 = vpop.f32.mrb[8].mxu0 }
 0x160   : > { %v6490_v44 = vadd.f32 %v4769_v32, %v6431_v25  ;;  %v1209_v42 = vpop.f32.mrb[9].mxu0  ;;  %v3327_v25 = vrot.slane %v2144_v2, 5 }
 0x161   : > { %v6493_v52 = vadd.f32 %v1209_v42, %v6433_v58  ;;  %v4770_v31 = vpop.f32.mrb[10].mxu0  ;;  %v2150_v58 = vshrl.u32 %v5466_v54, 16  ;;  %v6547_v54 = vpop.permute.xlu0 %2449 }
 0x162   : > { %v6498_v28 = vadd.f32 %v4770_v31, %v6436_v39  ;;  %v1212_v56 = vpop.f32.mrb[11].mxu0  ;;  %v2147_v39 = vor.u32 %v2146_v0, %v2143_v62  ;;  %v3328_v22 = vor.u32 %v3327_v25, %v3326_v18 }
 0x163   : > { %v6503_v1 = vadd.f32 %v1212_v56, %v6439_v30  ;;  %4924 = vmatmul.mubr.bf16.gmra.mrb[52].mxu1 %v6268_v5  ;;  %v3325_v5 = vsel %vm2707_vm1, %v3320_v36, %v6291_v48 }
 0x164   : > { %5068 = vmatmul.mubr.bf16.gmra.mrb[52].mxu0 %v6273_v61  ;;  %4927 = vmatprep.mubr.bf16.mxu1 %v2130_v15  ;;  %v2152_v61 = vrot.slane %v2150_v58, 3  ;;  %v2148_v38 = vsel %vm1371_vm2, %v6286_v16, %v2147_v39  ;;  %v3329_v57 = vsel %vm2707_vm1, %v6291_v48, %v3328_v22  ;;  %v3338_v59 = vsel %vm2707_vm1, %v3328_v22, %v3337_v8 }
 0x165   : > { %5071 = vmatprep.mubr.bf16.mxu0 %v3321_v4 }
 0x167   : > { %v4773_v21 = vpop.f32.mrb[12].mxu0 }
 0x168   : > { %v6510_v30 = vadd.f32 %v4773_v21, %v6443_v51  ;;  %v1225_v14 = vpop.f32.mrb[13].mxu0 }
 0x169   : > { %v6515_v40 = vadd.f32 %v1225_v14, %v6445_v45  ;;  %v4774_v12 = vpop.f32.mrb[14].mxu0  ;;  %v2156_v45 = vor.u32 %v2155_v63, %v2152_v61 }
 0x16a   : > { %v6520_v34 = vadd.f32 %v4774_v12, %v6447_v19  ;;  %v1228_v51 = vpop.f32.mrb[15].mxu0  ;;  %v6557_v12 = vpop.permute.xlu0 %2454 }
 0x16b   : > { %v6525_v17 = vadd.f32 %v1228_v51, %v6450_v43  ;;  %4928 = vmatmul.mubr.bf16.gmra.mrb[56].mxu1 %v2139_v41  ;;  %v2157_v29 = vsel %vm1371_vm2, %v2147_v39, %v2156_v45 }
 0x16c   : > { %5072 = vmatmul.mubr.bf16.gmra.mrb[56].mxu0 %v3325_v5  ;;  %4931 = vmatprep.mubr.bf16.mxu1 %v2148_v38  ;;  %v6559_v38 = vpop.permute.xlu1 %2464 }
 0x16d   : > { %5075 = vmatprep.mubr.bf16.mxu0 %v3329_v57 }
 0x16e   : > { %v4729_v24 = vpop.f32.mrb[16].mxu1 }
 0x16f   : > { %v4777_v16 = vpop.f32.mrb[16].mxu0  ;;  %v932_v26 = vpop.f32.mrb[17].mxu1 }
 0x170   : > { %v6527_v49 = vadd.f32 %v4777_v16, %v4729_v24  ;;  %v1241_v19 = vpop.f32.mrb[17].mxu0  ;;  %v4730_v23 = vpop.f32.mrb[18].mxu1 }
 0x171   : > { %v6530_v27 = vadd.f32 %v1241_v19, %v932_v26  ;;  %v4778_v48 = vpop.f32.mrb[18].mxu0  ;;  %v935_v43 = vpop.f32.mrb[19].mxu1 }
 0x172   : > { %6881 = vst [vmem:[#allocation9_spill] sm:$0xff] %v6527_v49  ;;  %v6533_v9 = vadd.f32 %v4778_v48, %v4730_v23  ;;  %v1244_v33 = vpop.f32.mrb[19].mxu0  ;;  %v6565_v19 = vpop.permute.xlu0 %2469 }
 0x173   : > { %6882 = vst [vmem:[#allocation10_spill] sm:$0xff] %v6530_v27  ;;  %v6535_v37 = vadd.f32 %v1244_v33, %v935_v43  ;;  %4932 = vmatmul.mubr.bf16.gmra.mrb[60].mxu1 %v2157_v29  ;;  %v6571_v43 = vpop.permute.xlu1 %2474 }
 0x174   : > { %6883 = vst [vmem:[#allocation11_spill] sm:$0xff] %v6533_v9  ;;  %5076 = vmatmul.mubr.bf16.gmra.mrb[60].mxu0 %v3338_v59 }
 0x175   : > { %6884 = vst [vmem:[#allocation12_spill] sm:$0xff] %v6535_v37 }
 0x176   : > { %v4733_v2 = vpop.f32.mrb[20].mxu1  ;;  %v6573_v59 = vpop.permute.xlu0 %2479 }
 0x177   : > { %v4781_v36 = vpop.f32.mrb[20].mxu0  ;;  %v948_v32 = vpop.f32.mrb[21].mxu1 }
 0x178   : > { %v6537_v42 = vadd.f32 %v4781_v36, %v4733_v2  ;;  %v1257_v31 = vpop.f32.mrb[21].mxu0  ;;  %v4734_v15 = vpop.f32.mrb[22].mxu1 }
 0x179   : > { %v6539_v62 = vadd.f32 %v1257_v31, %v948_v32  ;;  %v4782_v0 = vpop.f32.mrb[22].mxu0  ;;  %v951_v56 = vpop.f32.mrb[23].mxu1 }
 0x17a   : > { %6885 = vst [vmem:[#allocation13_spill] sm:$0xff] %v6537_v42  ;;  %v6541_v4 = vadd.f32 %v4782_v0, %v4734_v15  ;;  %v1260_v18 = vpop.f32.mrb[23].mxu0  ;;  %v6575_v33 = vpop.permute.xlu1 %2484 }
 0x17b   : > { %6886 = vst [vmem:[#allocation14_spill] sm:$0xff] %v6539_v62  ;;  %v6543_v25 = vadd.f32 %v1260_v18, %v951_v56  ;;  %v6577_v2 = vpop.permute.xlu0 %2489 }
 0x17c   : > { %6887 = vst [vmem:[#allocation15_spill] sm:$0xff] %v6541_v4 }
 0x17d   : > { %6888 = vst [vmem:[#allocation16_spill] sm:$0xff] %v6543_v25 }
 0x17e   : > { %v4737_v58 = vpop.f32.mrb[24].mxu1  ;;  %v6579_v36 = vpop.permute.xlu1 %2494 }
 0x17f   : > { %v4785_v3 = vpop.f32.mrb[24].mxu0  ;;  %v964_v39 = vpop.f32.mrb[25].mxu1 }
 0x180   : > { %v6549_v6 = vadd.f32 %v4785_v3, %v4737_v58  ;;  %v1273_v7 = vpop.f32.mrb[25].mxu0  ;;  %v4738_v22 = vpop.f32.mrb[26].mxu1 }
 0x181   : > { %v6551_v21 = vadd.f32 %v1273_v7, %v964_v39  ;;  %v4786_v41 = vpop.f32.mrb[26].mxu0  ;;  %v967_v14 = vpop.f32.mrb[27].mxu1 }
 0x182   : > { %6889 = vst [vmem:[#allocation17_spill] sm:$0xff] %v6549_v6  ;;  %v6553_v5 = vadd.f32 %v4786_v41, %v4738_v22  ;;  %v1276_v61 = vpop.f32.mrb[27].mxu0  ;;  %v6581_v32 = vpop.permute.xlu0 %2499 }
 0x183   : > { %6890 = vst [vmem:[#allocation18_spill] sm:$0xff] %v6551_v21  ;;  %v6555_v63 = vadd.f32 %v1276_v61, %v967_v14  ;;  %v6583_v31 = vpop.permute.xlu1 %2504 }
 0x184   : > { %6891 = vst [vmem:[#allocation19_spill] sm:$0xff] %v6553_v5 }
 0x185   : > { %6892 = vst [vmem:[#allocation20_spill] sm:$0xff] %v6555_v63 }
 0x186   : > { %v4741_v13 = vpop.f32.mrb[28].mxu1  ;;  %v6585_v15 = vpop.permute.xlu0 %2509 }
 0x187   : > { %v4789_v55 = vpop.f32.mrb[28].mxu0  ;;  %v980_v51 = vpop.f32.mrb[29].mxu1 }
 0x188   : > { %v6561_v57 = vadd.f32 %v4789_v55, %v4741_v13  ;;  %v1289_v45 = vpop.f32.mrb[29].mxu0  ;;  %v4742_v8 = vpop.f32.mrb[30].mxu1 }
 0x189   : > { %v6563_v24 = vadd.f32 %v1289_v45, %v980_v51  ;;  %v4790_v16 = vpop.f32.mrb[30].mxu0  ;;  %v983_v26 = vpop.f32.mrb[31].mxu1 }
 0x18a   : > { %6893 = vst [vmem:[#allocation21_spill] sm:$0xff] %v6561_v57  ;;  %v6567_v23 = vadd.f32 %v4790_v16, %v4742_v8  ;;  %v1292_v29 = vpop.f32.mrb[31].mxu0  ;;  %v6587_v0 = vpop.permute.xlu1 %2514 }
 0x18b   : > { %6894 = vst [vmem:[#allocation22_spill] sm:$0xff] %v6563_v24  ;;  %v6569_v48 = vadd.f32 %v1292_v29, %v983_v26  ;;  %v6589_v56 = vpop.permute.xlu0 %2519 }
 0x18c   : > { %6895 = vst [vmem:[#allocation23_spill] sm:$0xff] %v6567_v23 }
 0x18d   : > { %6896 = vst [vmem:[#allocation24_spill] sm:$0xff] %v6569_v48 }
 0x18e   : > { %v6591_v18 = vpop.permute.xlu1 %2524 }
 0x18f   : > { %v6593_v58 = vpop.permute.xlu0 %2529 }
 0x190   : > { %6897 = vst [vmem:[#allocation25_spill] sm:$0xff] %v6593_v58 }
 0x192   : > { %v6595_v3 = vpop.permute.xlu1 %2534 }
 0x193   : > { %6898 = vst [vmem:[#allocation26_spill] sm:$0xff] %v6595_v3  ;;  %v6597_v39 = vpop.permute.xlu0 %2539 }
 0x196   : > { %v6599_v7 = vpop.permute.xlu1 %2544 }
 0x197   : > { %6899 = vst [vmem:[#allocation27_spill] sm:$0xff] %v6599_v7  ;;  %v6601_v22 = vpop.permute.xlu0 %2549 }
 0x198   : > { %6900 = vst [vmem:[#allocation28_spill] sm:$0xff] %v6601_v22 }
 0x19a   : > { %v6603_v41 = vpop.permute.xlu1 %2554 }
 0x19b   : > { %6901 = vst [vmem:[#allocation29_spill] sm:$0xff] %v6603_v41  ;;  %v6605_v14 = vpop.permute.xlu0 %2559 }
 0x19c   : > { %6902 = vst [vmem:[#allocation30_spill] sm:$0xff] %v6605_v14 }
 0x19e   : > { %v6607_v61 = vpop.permute.xlu1 %2564 }
 0x19f   : > { %6903 = vst [vmem:[#allocation31_spill] sm:$0xff] %v6607_v61  ;;  %v6609_v13 = vpop.permute.xlu0 %2569 }
 0x1a0   : > { %6904 = vst [vmem:[#allocation32_spill] sm:$0xff] %v6609_v13 }
 0x1a2   : > { %v6611_v55 = vpop.permute.xlu1 %2574 }
 0x1a3   : > { %6905 = vst [vmem:[#allocation33_spill] sm:$0xff] %v6611_v55  ;;  %v6613_v51 = vpop.permute.xlu0 %2579 }
 0x1a4   : > { %6906 = vst [vmem:[#allocation34_spill] sm:$0xff] %v6613_v51 }
 0x1a6   : > { %v6615_v45 = vpop.permute.xlu1 %2584 }
 0x1a7   : > { %6907 = vst [vmem:[#allocation35_spill] sm:$0xff] %v6615_v45  ;;  %v6617_v8 = vpop.permute.xlu0 %2589 }
 0x1a8   : > { %6908 = vst [vmem:[#allocation36_spill] sm:$0xff] %v6617_v8 }
 0x1aa   : > { %v6619_v16 = vpop.permute.xlu1 %2594 }
 0x1ab   : > { %6909 = vst [vmem:[#allocation37_spill] sm:$0xff] %v6619_v16  ;;  %v6621_v26 = vpop.permute.xlu0 %2599 }
 0x1ac   : > { %6910 = vst [vmem:[#allocation38_spill] sm:$0xff] %v6621_v26 }
 0x1ae   : > { %v6623_v29 = vpop.permute.xlu1 %2604 }
 0x1af   : > { %6911 = vst [vmem:[#allocation39_spill] sm:$0xff] %v6623_v29  ;;  %v3631_v48 = vpop.permute.xlu0 %3630 }
 0x1b2   : > { %v3636_v23 = vpop.permute.xlu1 %3635 }
 0x1b3   : > { %v3641_v24 = vpop.permute.xlu0 %3640 }
 0x1b6   : > { %v3646_v57 = vpop.permute.xlu1 %3645 }
 0x1b7   : > { %v3651_v63 = vpop.permute.xlu0 %3650 }
 0x1ba   : > { %v6625_v5 = vpop.permute.xlu1 %3655 }
 0x1bb   : > { %v3661_v55 = vpop.permute.xlu0 %3660 }
 0x1be   : > { %v6627_v21 = vpop.permute.xlu1 %3665 }
 0x1bf   : > { %v6629_v6 = vpop.permute.xlu0 %3670 }
 0x1c2   : > { %v6631_v45 = vpop.permute.xlu1 %3675 }
 0x1c3   : > { %v6633_v8 = vpop.permute.xlu0 %3680 }
 0x1c6   : > { %v6635_v16 = vpop.permute.xlu1 %3685 }
 0x1c7   : > { %v6637_v26 = vpop.permute.xlu0 %3690 }
 0x1ca   : > { %v6639_v29 = vpop.permute.xlu1 %3695 }
 0x1cb   : > { %v6641_v13 = vpop.permute.xlu0 %3700 }
 0x1ce   : > { %v6643_v51 = vpop.permute.xlu1 %3705 }
 0x1cf   : > { %v6645_v25 = vpop.permute.xlu0 %3710 }
 0x1d0   : > { %6912 = vst [vmem:[#allocation40_spill] sm:$0xff] %v6645_v25 }
 0x20e   : > { %v4905_v4 = vpop.f32.mrb[32].mxu1 }
 0x20f   : > { %v2609_v41 = vmul.f32 %v4905_v4, %v6545_v47  ;;  %v5049_v62 = vpop.f32.mrb[32].mxu0  ;;  %v2256_v61 = vpop.f32.mrb[33].mxu1 }
 0x210   : > { %v2607_v42 = vmul.f32 %v6547_v54, %v2256_v61  ;;  %v3437_v22 = vpop.f32.mrb[33].mxu0  ;;  %v4906_v14 = vpop.f32.mrb[34].mxu1  ;;  %v3790_v9 = vmul.f32 %v5049_v62, %v3641_v24 }
 0x211   : > { %v2641_v37 = vadd.f32 %v6458_v53, %v2609_v41  ;;  %v2610_v3 = vmul.f32 %v4906_v14, %v6559_v38  ;;  %v5050_v27 = vpop.f32.mrb[34].mxu0  ;;  %v2259_v7 = vpop.f32.mrb[35].mxu1  ;;  %v3788_v25 = vmul.f32 %v3631_v48, %v3437_v22  ;;  %v6658_v53 = vld [vmem:[%s6866_s2] ss:$0 sm:$0xff] }
 0x212   : > { %v2639_v49 = vadd.f32 %v6461_v35, %v2607_v42  ;;  %v2608_v4 = vmul.f32 %v6557_v12, %v2259_v7  ;;  %v3440_v47 = vpop.f32.mrb[35].mxu0  ;;  %v3791_v61 = vmul.f32 %v5050_v27, %v3646_v57  ;;  %v6661_v41 = vpop.permute.xlu1 %3715 }
 0x213   : > { %v3822_v58 = vadd.f32 %v3790_v9, %v2641_v37  ;;  %v2642_v54 = vadd.f32 %v6465_v60, %v2610_v3  ;;  %v3789_v24 = vmul.f32 %v3636_v23, %v3440_v47  ;;  %v6665_v42 = vpop.permute.xlu0 %3720 }
 0x214   : > { %v3820_v62 = vadd.f32 %v3788_v25, %v2639_v49  ;;  %v2640_v38 = vadd.f32 %v6469_v11, %v2608_v4 }
 0x215   : > { %v3823_v35 = vadd.f32 %v3791_v61, %v2642_v54  ;;  %v3861_v60 = vadd.f32 %v6658_v53, %v3822_v58 }
 0x216   : > { %v3821_v9 = vadd.f32 %v3789_v24, %v2640_v38  ;;  %v4909_v37 = vpop.f32.mrb[36].mxu1  ;;  %v3859_v11 = vadd.f32 %v6658_v53, %v3820_v62 }
 0x217   : > { %v3862_v27 = vadd.f32 %v6658_v53, %v3823_v35  ;;  %v2613_v12 = vmul.f32 %v4909_v37, %v6573_v59  ;;  %v5053_v57 = vpop.f32.mrb[36].mxu0  ;;  %v2272_v49 = vpop.f32.mrb[37].mxu1 }
 0x218   : > { %v3860_v25 = vadd.f32 %v6658_v53, %v3821_v9  ;;  %v2611_v23 = vmul.f32 %v6565_v19, %v2272_v49  ;;  %v3453_v48 = vpop.f32.mrb[37].mxu0  ;;  %v4910_v3 = vpop.f32.mrb[38].mxu1  ;;  %v3794_v14 = vmul.f32 %v5053_v57, %v3661_v55 }
 0x219   : > { %v4344_v7 = vpack.c.bf16 %v3862_v27, %v3861_v60  ;;  %v2645_v22 = vadd.f32 %v6472_v50, %v2613_v12  ;;  %v2614_v58 = vmul.f32 %v4910_v3, %v6575_v33  ;;  %v5054_v4 = vpop.f32.mrb[38].mxu0  ;;  %v2275_v47 = vpop.f32.mrb[39].mxu1  ;;  %v3792_v61 = vmul.f32 %v3651_v63, %v3453_v48 }
 0x21a   : > { %v4339_v54 = vpack.c.bf16 %v3860_v25, %v3859_v11  ;;  %v2643_v59 = vadd.f32 %v6477_v46, %v2611_v23  ;;  %v2612_v62 = vmul.f32 %v6571_v43, %v2275_v47  ;;  %v3456_v38 = vpop.f32.mrb[39].mxu0  ;;  %v3795_v55 = vmul.f32 %v5054_v4, %v6627_v21  ;;  %v6685_v63 = vpop.permute.xlu1 %3725 }
 0x21b   : > { %4416 = vst [vmem:[%s6677_s10 + $0x8] sm:$0xff] %v4344_v7   ;;  %v3826_v19 = vadd.f32 %v3794_v14, %v2645_v22  ;;  %v2646_v50 = vadd.f32 %v6482_v10, %v2614_v58  ;;  %v3793_v46 = vmul.f32 %v6625_v5, %v3456_v38  ;;  %v6687_v35 = vpop.permute.xlu0 %3730 }
 0x21c   : > { %4340 = vst [vmem:[%s6677_s10] sm:$0xff] %v4339_v54   ;;  %v3824_v33 = vadd.f32 %v3792_v61, %v2643_v59  ;;  %v2644_v24 = vadd.f32 %v6487_v20, %v2612_v62 }
 0x21d   : > { %v3827_v43 = vadd.f32 %v3795_v55, %v2646_v50  ;;  %v3865_v60 = vadd.f32 %v6658_v53, %v3826_v19 }
 0x21e   : > { %v3825_v9 = vadd.f32 %v3793_v46, %v2644_v24  ;;  %v4913_v37 = vpop.f32.mrb[40].mxu1  ;;  %v3863_v57 = vadd.f32 %v6658_v53, %v3824_v33  ;;  %v6707_v61 = vpop.permute.xlu1 %3735 }
 0x21f   : > { %v3866_v27 = vadd.f32 %v6658_v53, %v3827_v43  ;;  %v2617_v10 = vmul.f32 %v4913_v37, %v6581_v32  ;;  %v5057_v21 = vpop.f32.mrb[40].mxu0  ;;  %v2288_v12 = vpop.f32.mrb[41].mxu1 }
 0x220   : > { %v3864_v20 = vadd.f32 %v6658_v53, %v3825_v9  ;;  %v2615_v5 = vmul.f32 %v6577_v2, %v2288_v12  ;;  %v3469_v49 = vpop.f32.mrb[41].mxu0  ;;  %v4914_v11 = vpop.f32.mrb[42].mxu1  ;;  %v3798_v48 = vmul.f32 %v5057_v21, %v6633_v8 }
 0x221   : > { %v4354_v25 = vpack.c.bf16 %v3866_v27, %v3865_v60  ;;  %v2649_v23 = vadd.f32 %v6490_v44, %v2617_v10  ;;  %v2618_v3 = vmul.f32 %v4914_v11, %v6583_v31  ;;  %v5058_v32 = vpop.f32.mrb[42].mxu0  ;;  %v2291_v7 = vpop.f32.mrb[43].mxu1  ;;  %v3796_v58 = vmul.f32 %v6629_v6, %v3469_v49 }
 0x222   : > { %v4349_v22 = vpack.c.bf16 %v3864_v20, %v3863_v57  ;;  %v2647_v14 = vadd.f32 %v6493_v52, %v2615_v5  ;;  %v2616_v4 = vmul.f32 %v6579_v36, %v2291_v7  ;;  %v3472_v2 = vpop.f32.mrb[43].mxu0  ;;  %v3799_v44 = vmul.f32 %v5058_v32, %v6635_v16  ;;  %v6709_v62 = vpop.permute.xlu0 %3740 }
 0x223   : > { %4418 = vst [vmem:[%s6677_s10 + $0x18] sm:$0xff] %v4354_v25   ;;  %v3830_v47 = vadd.f32 %v3798_v48, %v2649_v23  ;;  %v2650_v54 = vadd.f32 %v6498_v28, %v2618_v3  ;;  %v3797_v59 = vmul.f32 %v6631_v45, %v3472_v2  ;;  %v6729_v49 = vpop.permute.xlu1 %3745 }
 0x224   : > { %4417 = vst [vmem:[%s6677_s10 + $0x10] sm:$0xff] %v4349_v22   ;;  %v3828_v8 = vadd.f32 %v3796_v58, %v2647_v14  ;;  %v2648_v31 = vadd.f32 %v6503_v1, %v2616_v4  ;;  %v6914_v58 = vld [vmem:[#allocation9_spill] sm:$0xff] }
 0x225   : > { %v3831_v52 = vadd.f32 %v3799_v44, %v2650_v54  ;;  %v3869_v38 = vadd.f32 %v6658_v53, %v3830_v47  ;;  %v6915_v47 = vld [vmem:[#allocation27_spill] sm:$0xff] }
 0x226   : > { %v3829_v6 = vadd.f32 %v3797_v59, %v2648_v31  ;;  %v4917_v36 = vpop.f32.mrb[44].mxu1  ;;  %v3867_v55 = vadd.f32 %v6658_v53, %v3828_v8  ;;  %v6731_v11 = vpop.permute.xlu0 %3750  ;;  %v6916_v31 = vld [vmem:[#allocation10_spill] sm:$0xff] }
 0x227   : > { %v3870_v19 = vadd.f32 %v6658_v53, %v3831_v52  ;;  %v2621_v28 = vmul.f32 %v4917_v36, %v6589_v56  ;;  %v5061_v16 = vpop.f32.mrb[44].mxu0  ;;  %v2304_v50 = vpop.f32.mrb[45].mxu1  ;;  %v6917_v52 = vld [vmem:[#allocation40_spill] sm:$0xff]  ;;  %v6918_v36 = vld [vmem:[#allocation26_spill] sm:$0xff] }
 0x228   : > { %v3868_v1 = vadd.f32 %v6658_v53, %v3829_v6  ;;  %v2619_v45 = vmul.f32 %v6585_v15, %v2304_v50  ;;  %v3485_v33 = vpop.f32.mrb[45].mxu0  ;;  %v4918_v24 = vpop.f32.mrb[46].mxu1  ;;  %v3802_v9 = vmul.f32 %v5061_v16, %v6641_v13  ;;  %v6919_v16 = vld [vmem:[#allocation11_spill] sm:$0xff] }
 0x229   : > { %v4364_v46 = vpack.c.bf16 %v3870_v19, %v3869_v38  ;;  %v2653_v43 = vadd.f32 %v6510_v30, %v2621_v28  ;;  %v2622_v37 = vmul.f32 %v4918_v24, %v6591_v18  ;;  %v5062_v56 = vpop.f32.mrb[46].mxu0  ;;  %v2307_v60 = vpop.f32.mrb[47].mxu1  ;;  %v3800_v21 = vmul.f32 %v6637_v26, %v3485_v33 }
 0x22a   : > { %v4359_v27 = vpack.c.bf16 %v3868_v1, %v3867_v55  ;;  %v2651_v10 = vadd.f32 %v6515_v40, %v2619_v45  ;;  %v2620_v12 = vmul.f32 %v6587_v0, %v2307_v60  ;;  %v3488_v15 = vpop.f32.mrb[47].mxu0  ;;  %v3803_v30 = vmul.f32 %v5062_v56, %v6643_v51  ;;  %v6920_v1 = vld [vmem:[#allocation12_spill] sm:$0xff]  ;;  %v6751_v24 = vpop.permute.xlu1 %3755 }
 0x22b   : > { %4420 = vst [vmem:[%s6677_s10 + $0x28] sm:$0xff] %v4364_v46   ;;  %v3834_v57 = vadd.f32 %v3802_v9, %v2653_v43  ;;  %v2654_v20 = vadd.f32 %v6520_v34, %v2622_v37  ;;  %v3801_v5 = vmul.f32 %v6639_v29, %v3488_v15  ;;  %v6913_v29 = vld [vmem:[#allocation25_spill] sm:$0xff]  ;;  %v3761_v43 = vpop.permute.xlu0 %3760 }
 0x22c   : > { %4419 = vst [vmem:[%s6677_s10 + $0x20] sm:$0xff] %v4359_v27   ;;  %v3832_v13 = vadd.f32 %v3800_v21, %v2651_v10  ;;  %v2652_v18 = vadd.f32 %v6525_v17, %v2620_v12  ;;  %v6921_v27 = vld [vmem:[#allocation30_spill] sm:$0xff] }
 0x22d   : > { %v3835_v40 = vadd.f32 %v3803_v30, %v2654_v20  ;;  %v3873_v25 = vadd.f32 %v6658_v53, %v3834_v57 }
 0x22e   : > { %v3833_v26 = vadd.f32 %v3801_v5, %v2652_v18  ;;  %v4921_v0 = vpop.f32.mrb[48].mxu1  ;;  %v3871_v3 = vadd.f32 %v6658_v53, %v3832_v13  ;;  %v6923_v18 = vld [vmem:[#allocation13_spill] sm:$0xff] }
 0x22f   : > { %v3874_v23 = vadd.f32 %v6658_v53, %v3835_v40  ;;  %v2625_v34 = vmul.f32 %v4921_v0, %v6597_v39  ;;  %v5065_v51 = vpop.f32.mrb[48].mxu0  ;;  %v2320_v48 = vpop.f32.mrb[49].mxu1 }
 0x230   : > { %v3872_v17 = vadd.f32 %v6658_v53, %v3833_v26  ;;  %v2623_v32 = vmul.f32 %v6913_v29, %v2320_v48  ;;  %v3501_v7 = vpop.f32.mrb[49].mxu0  ;;  %v4922_v22 = vpop.f32.mrb[50].mxu1  ;;  %v3806_v2 = vmul.f32 %v5065_v51, %v6665_v42  ;;  %v6924_v26 = vld [vmem:[#allocation31_spill] sm:$0xff]  ;;  %v6925_v51 = vld [vmem:[#allocation14_spill] sm:$0xff] }
 0x231   : > { %v4374_v14 = vpack.c.bf16 %v3874_v23, %v3873_v25  ;;  %v2657_v4 = vadd.f32 %v6914_v58, %v2625_v34  ;;  %v2626_v54 = vmul.f32 %v4922_v22, %v6915_v47  ;;  %v5066_v39 = vpop.f32.mrb[50].mxu0  ;;  %v2323_v44 = vpop.f32.mrb[51].mxu1  ;;  %v3804_v6 = vmul.f32 %v6917_v52, %v3501_v7  ;;  %v6927_v22 = vld [vmem:[#allocation15_spill] sm:$0xff]  ;;  %v6929_v52 = vld [vmem:[#allocation34_spill] sm:$0xff] }
 0x232   : > { %v4369_v8 = vpack.c.bf16 %v3872_v17, %v3871_v3  ;;  %v2655_v59 = vadd.f32 %v6916_v31, %v2623_v32  ;;  %v2624_v38 = vmul.f32 %v6918_v36, %v2323_v44  ;;  %v3504_v19 = vpop.f32.mrb[51].mxu0  ;;  %v3807_v55 = vmul.f32 %v5066_v39, %v6685_v63  ;;  %v6926_v17 = vld [vmem:[#allocation29_spill] sm:$0xff]  ;;  %v3771_v44 = vpop.permute.xlu0 %3770 }
 0x233   : > { %4422 = vst [vmem:[%s6677_s10 + $0x38] sm:$0xff] %v4374_v14   ;;  %v3838_v28 = vadd.f32 %v3806_v2, %v2657_v4  ;;  %v2658_v50 = vadd.f32 %v6919_v16, %v2626_v54  ;;  %v3805_v33 = vmul.f32 %v6661_v41, %v3504_v19  ;;  %v6922_v41 = vld [vmem:[#allocation28_spill] sm:$0xff]  ;;  %v3766_v54 = vpop.permute.xlu1 %3765 }
 0x234   : > { %4421 = vst [vmem:[%s6677_s10 + $0x30] sm:$0xff] %v4369_v8   ;;  %v3836_v42 = vadd.f32 %v3804_v6, %v2655_v59  ;;  %v2656_v45 = vadd.f32 %v6920_v1, %v2624_v38  ;;  %v6928_v4 = vld [vmem:[#allocation16_spill] sm:$0xff] }
 0x235   : > { %v3839_v46 = vadd.f32 %v3807_v55, %v2658_v50  ;;  %v3877_v56 = vadd.f32 %v6658_v53, %v3838_v28  ;;  %v6930_v28 = vld [vmem:[#allocation32_spill] sm:$0xff] }
 0x236   : > { %v3837_v9 = vadd.f32 %v3805_v33, %v2656_v45  ;;  %v4925_v37 = vpop.f32.mrb[52].mxu1  ;;  %v3875_v12 = vadd.f32 %v6658_v53, %v3836_v42  ;;  %v6931_v42 = vld [vmem:[#allocation17_spill] sm:$0xff]  ;;  %v6932_v33 = vld [vmem:[#allocation35_spill] sm:$0xff] }
 0x237   : > { %v3878_v60 = vadd.f32 %v6658_v53, %v3839_v46  ;;  %v2629_v10 = vmul.f32 %v4925_v37, %v6921_v27  ;;  %v5069_v21 = vpop.f32.mrb[52].mxu0  ;;  %v2336_v63 = vpop.f32.mrb[53].mxu1 }
 0x238   : > { %v3876_v15 = vadd.f32 %v6658_v53, %v3837_v9  ;;  %v2627_v57 = vmul.f32 %v6922_v41, %v2336_v63  ;;  %v3517_v20 = vpop.f32.mrb[53].mxu0  ;;  %v4926_v30 = vpop.f32.mrb[54].mxu1  ;;  %v3810_v40 = vmul.f32 %v5069_v21, %v6709_v62  ;;  %v6934_v21 = vld [vmem:[#allocation33_spill] sm:$0xff]  ;;  %v6935_v41 = vld [vmem:[#allocation19_spill] sm:$0xff] }
 0x239   : > { %v4384_v13 = vpack.c.bf16 %v3878_v60, %v3877_v56  ;;  %v2661_v5 = vadd.f32 %v6923_v18, %v2629_v10  ;;  %v2630_v0 = vmul.f32 %v4926_v30, %v6924_v26  ;;  %v5070_v25 = vpop.f32.mrb[54].mxu0  ;;  %v2339_v23 = vpop.f32.mrb[55].mxu1  ;;  %v3808_v3 = vmul.f32 %v6687_v35, %v3517_v20  ;;  %v6933_v60 = vld [vmem:[#allocation18_spill] sm:$0xff] }
 0x23a   : > { %v4379_v34 = vpack.c.bf16 %v3876_v15, %v3875_v12  ;;  %v2659_v48 = vadd.f32 %v6925_v51, %v2627_v57  ;;  %v2628_v29 = vmul.f32 %v6926_v17, %v2339_v23  ;;  %v3520_v32 = vpop.f32.mrb[55].mxu0  ;;  %v3811_v58 = vmul.f32 %v5070_v25, %v6729_v49  ;;  %v3776_v30 = vpop.permute.xlu1 %3775 }
 0x23b   : > { %4424 = vst [vmem:[%s6677_s10 + $0x48] sm:$0xff] %v4384_v13   ;;  %v3842_v7 = vadd.f32 %v3810_v40, %v2661_v5  ;;  %v2662_v14 = vadd.f32 %v6927_v22, %v2630_v0  ;;  %v3809_v47 = vmul.f32 %v6707_v61, %v3520_v32  ;;  %v6936_v13 = vld [vmem:[#allocation20_spill] sm:$0xff]  ;;  %v3781_v26 = vpop.permute.xlu0 %3780 }
 0x23c   : > { %4423 = vst [vmem:[%s6677_s10 + $0x40] sm:$0xff] %v4379_v34   ;;  %v3840_v62 = vadd.f32 %v3808_v3, %v2659_v48  ;;  %v2660_v2 = vadd.f32 %v6928_v4, %v2628_v29  ;;  %v6937_v34 = vld [vmem:[#allocation38_spill] sm:$0xff]  ;;  %v6938_v32 = vld [vmem:[#allocation36_spill] sm:$0xff] }
 0x23d   : > { %v3843_v39 = vadd.f32 %v3811_v58, %v2662_v14  ;;  %v3881_v31 = vadd.f32 %v6658_v53, %v3842_v7  ;;  %v6939_v58 = vld [vmem:[#allocation21_spill] sm:$0xff] }
 0x23e   : > { %v3841_v8 = vadd.f32 %v3809_v47, %v2660_v2  ;;  %v4929_v35 = vpop.f32.mrb[56].mxu1  ;;  %v3879_v49 = vadd.f32 %v6658_v53, %v3840_v62  ;;  %v6940_v2 = vld [vmem:[#allocation39_spill] sm:$0xff] }
 0x23f   : > { %v3882_v59 = vadd.f32 %v6658_v53, %v3843_v39  ;;  %v2633_v6 = vmul.f32 %v4929_v35, %v6929_v52  ;;  %v5073_v36 = vpop.f32.mrb[56].mxu0  ;;  %v2352_v38 = vpop.f32.mrb[57].mxu1 }
 0x240   : > { %v3880_v19 = vadd.f32 %v6658_v53, %v3841_v8  ;;  %v2631_v61 = vmul.f32 %v6930_v28, %v2352_v38  ;;  %v3533_v16 = vpop.f32.mrb[57].mxu0  ;;  %v4930_v50 = vpop.f32.mrb[58].mxu1  ;;  %v3814_v45 = vmul.f32 %v5073_v36, %v3761_v43 }
 0x241   : > { %v4394_v55 = vpack.c.bf16 %v3882_v59, %v3881_v31  ;;  %v2665_v1 = vadd.f32 %v6931_v42, %v2633_v6  ;;  %v2634_v46 = vmul.f32 %v4930_v50, %v6932_v33  ;;  %v5074_v9 = vpop.f32.mrb[58].mxu0  ;;  %v2355_v37 = vpop.f32.mrb[59].mxu1  ;;  %v3812_v10 = vmul.f32 %v6731_v11, %v3533_v16  ;;  %v6941_v31 = vld [vmem:[#allocation22_spill] sm:$0xff]  ;;  %v6942_v6 = vld [vmem:[#allocation37_spill] sm:$0xff]  ;;  %v6944_v50 = vld [vmem:[#allocation24_spill] sm:$0xff] }
 0x242   : > { %v4389_v56 = vpack.c.bf16 %v3880_v19, %v3879_v49  ;;  %v2663_v27 = vadd.f32 %v6933_v60, %v2631_v61  ;;  %v2632_v63 = vmul.f32 %v6934_v21, %v2355_v37  ;;  %v3536_v12 = vpop.f32.mrb[59].mxu0  ;;  %v3815_v20 = vmul.f32 %v5074_v9, %v3766_v54  ;;  %v3786_v8 = vpop.permute.xlu1 %3785  ;;  %v6943_v19 = vld [vmem:[#allocation23_spill] sm:$0xff] }
 0x243   : > { %4426 = vst [vmem:[%s6677_s10 + $0x58] sm:$0xff] %v4394_v55   ;;  %v3846_v15 = vadd.f32 %v3814_v45, %v2665_v1  ;;  %v2666_v57 = vadd.f32 %v6935_v41, %v2634_v46  ;;  %v3813_v5 = vmul.f32 %v6751_v24, %v3536_v12 }
 0x244   : > { %4425 = vst [vmem:[%s6677_s10 + $0x50] sm:$0xff] %v4389_v56   ;;  %v3844_v43 = vadd.f32 %v3812_v10, %v2663_v27  ;;  %v2664_v18 = vadd.f32 %v6936_v13, %v2632_v63 }
 0x245   : > { %v3847_v40 = vadd.f32 %v3815_v20, %v2666_v57  ;;  %v3885_v11 = vadd.f32 %v6658_v53, %v3846_v15 }
 0x246   : > { %v3845_v0 = vadd.f32 %v3813_v5, %v2664_v18  ;;  %v4933_v25 = vpop.f32.mrb[60].mxu1  ;;  %v3883_v17 = vadd.f32 %v6658_v53, %v3844_v43 }
 0x247   : > { %v3886_v23 = vadd.f32 %v6658_v53, %v3847_v40  ;;  %v2637_v51 = vmul.f32 %v4933_v25, %v6937_v34  ;;  %v5077_v48 = vpop.f32.mrb[60].mxu0  ;;  %v2368_v3 = vpop.f32.mrb[61].mxu1 }
 0x248   : > { %v3884_v29 = vadd.f32 %v6658_v53, %v3845_v0  ;;  %v2635_v7 = vmul.f32 %v6938_v32, %v2368_v3  ;;  %v3549_v24 = vpop.f32.mrb[61].mxu0  ;;  %v4934_v22 = vpop.f32.mrb[62].mxu1  ;;  %v3818_v4 = vmul.f32 %v5077_v48, %v3781_v26 }
 0x249   : > { %v4404_v14 = vpack.c.bf16 %v3886_v23, %v3885_v11  ;;  %v2669_v62 = vadd.f32 %v6939_v58, %v2637_v51  ;;  %v2638_v47 = vmul.f32 %v4934_v22, %v6940_v2  ;;  %v5078_v54 = vpop.f32.mrb[62].mxu0  ;;  %v2371_v39 = vpop.f32.mrb[63].mxu1  ;;  %v3816_v52 = vmul.f32 %v3771_v44, %v3549_v24 }
 0x24a   : > { %v4399_v35 = vpack.c.bf16 %v3884_v29, %v3883_v17  ;;  %v2667_v59 = vadd.f32 %v6941_v31, %v2635_v7  ;;  %v2636_v36 = vmul.f32 %v6942_v6, %v2371_v39  ;;  %v3552_v38 = vpop.f32.mrb[63].mxu0  ;;  %v3819_v61 = vmul.f32 %v5078_v54, %v3786_v8 }
 0x24b   : > { %4428 = vst [vmem:[%s6677_s10 + $0x68] sm:$0xff] %v4404_v14   ;;  %v3850_v49 = vadd.f32 %v3818_v4, %v2669_v62  ;;  %v2670_v28 = vadd.f32 %v6943_v19, %v2638_v47  ;;  %v3817_v42 = vmul.f32 %v3776_v30, %v3552_v38 }
 0x24c   : > { %4427 = vst [vmem:[%s6677_s10 + $0x60] sm:$0xff] %v4399_v35   ;;  %v3848_v16 = vadd.f32 %v3816_v52, %v2667_v59  ;;  %v2668_v55 = vadd.f32 %v6944_v50, %v2636_v36 }
 0x24d   : > { %v3851_v1 = vadd.f32 %v3819_v61, %v2670_v28  ;;  %v3889_v44 = vadd.f32 %v6658_v53, %v3850_v49 }
 0x24e   : > { %v3849_v45 = vadd.f32 %v3817_v42, %v2668_v55  ;;  %v3887_v46 = vadd.f32 %v6658_v53, %v3848_v16 }
 0x24f   : > { %v3890_v33 = vadd.f32 %v6658_v53, %v3851_v1 }
 0x250   : > { %v3888_v9 = vadd.f32 %v6658_v53, %v3849_v45 }
 0x251   : > { %v4414_v37 = vpack.c.bf16 %v3890_v33, %v3889_v44 }
 0x252   : > { %v4409_v56 = vpack.c.bf16 %v3888_v9, %v3887_v46 }
 0x253   : > { %4430 = vst [vmem:[%s6677_s10 + $0x78] sm:$0xff] %v4414_v37  }
 0x254   : > { %4429 = vst [vmem:[%s6677_s10 + $0x70] sm:$0xff] %v4409_v56  }
 0x255   : > { %5508 = shalt.err (!%p5505_p6)
}
 0x256   : > { %s5509_s29 = scalar_lea.hbm %s6810_s16, 2048  ;;  %s5513_s7 = scalar_lea.hbm %s6869_s5, 4096 }
 0x257   : > { %p5510_p7 = scmp.ne.s32.totalorder %s6810_s16, %s5509_s29  ;;  %p5514_p0 = scmp.lt.u32.totalorder %s6810_s16, %s6869_s5 }
 0x258   : > { %p5515_p2 = scmp.lt.u32.totalorder %s5513_s7, %s5509_s29  ;;  %p5517_p8 = scmp.lt.u32.totalorder %s5509_s29, %s6810_s16 }
 0x259   : > { %p5511_p9 = pnand %p5510_p7, %p6945_p10 }
 0x25a   : > { %p5516_p4 = por %p5515_p2, %p5514_p0 }
 0x25b   : > { %p5512_p12 = pneg %p5511_p9 }
 0x25c   : > { %p5518_p11 = por %p5517_p8, %p5516_p4 }
 0x25e   : > { %p5519_p13 = pnand %p5518_p11, %p5512_p12 }
 0x260   : > { %5522 = shalt.err (!%p5519_p13)
}
 0x261   : > { %s5584_s11 = smov 64   ;;  %s5585_s14 = smov 4  }
 0x262   : > { %5291 = dma.vmem_to_hbm [thread:$0]  (%p6945_p10), %s6812_s13, 2048, %s6810_s16, %s6818_s21, %s5584_s11, %s5584_s11, %s5585_s14  }
 0x263 PF: > { %p5303_p1 = scmp.ge.s32.totalorder %s5577_s23, 2  ;;  %s4081_s15 = sand.u32 1, %s5557_s18  }
 0x264   : > { %p6946_p3 = scmp.ne.s32.totalorder %s6875_s30, 0  ;;  %s4082_s17 = scalar_lea.sflag [#allocation5], %s4081_s15 }
 0x266   : > { %p5298_p5 = pnand %p5303_p1, %p6946_p3 }
 0x268   : > { %5552 = dma.done.wait (!%p5298_p5), %s4082_s17, 2048  }
 0x269   : > { %5554 = vsyncadd (!%p5298_p5), %s4082_s17, 4294965248  ;;  %s19_s23 = sadd.s32 1, %s5577_s23   ;;  %s6947_s18 = smov %s5561_s19 }
 0x26a   : > { %p16_p6 = scmp.ge.s32.totalorder %s19_s23, 4   ;;  %s6948_s19 = smov %s5565_s20 }
 0x26b   : > { %s6949_s20 = smov %s5669_s6  ;;  %s6950_s21 = smov %s5573_s22 }
 0x26c   : > { %s6951_s22 = smov %s6953_s26  ;;  %18 = sbr.rel (!%p16_p6) target bundleno = 5 (0x5), region = 96 }
 0x273   :  { %4087 = vsyncpa [#allocation4], 1 }
 0x274   :  { %4089 = vsyncpa [#allocation4 + $0x1], 1 }
 0x275   :  { %4090 = vsyncpa [#allocation5], 1 }
 0x276   :  { %4092 = vsyncpa [#allocation5 + $0x1], 1 }

</bundles_post_ra>
